<compile_context>
chip_gen: v6e
topology: v6e:2x2x1
jax: 0.10.0
libtpu: 0.0.40
codegen_flags: <defaults>
</compile_context>

<pallas_src>
import jax
import jax.numpy as jnp
from jax.experimental import pallas as pl
from jax.experimental.pallas import tpu as pltpu


# ----------------------------- Pallas kernel --------------------------------
def ae_kernel(emb_ref, x_ref,
              ew1, eb1, ew2, eb2, ew3, eb3, ew4, eb4,
              dw1, db1, dw2, db2, dw3, db3, dw4, db4,
              latent_ref, logits_ref, sse_ref):
    """Fused encoder -> (+user_embeds) -> decoder -> per-row SSE for one batch tile.

    Weights may be bf16 (MXU-native on v6e/v7x); activations are cast to the weight
    dtype right before each matmul and accumulated in f32 (preferred_element_type).
    Bias adds / tanh / SSE stay in f32 so VPU/EUP work is f32 on all generations.
    """
    x = x_ref[...]                                                    # (tb, dim) f32
    wdt = ew1.dtype

    def dense(h, w_ref, b_ref):
        return jnp.dot(h.astype(wdt), w_ref[...],
                       preferred_element_type=jnp.float32) + b_ref[...]

    # --- encoder: Linear -> Tanh x3, final Linear (output lane-padded to 128k) ---
    h = jnp.tanh(dense(x, ew1, eb1))
    h = jnp.tanh(dense(h, ew2, eb2))
    h = jnp.tanh(dense(h, ew3, eb3))
    latent = dense(h, ew4, eb4)                                       # (tb, lp) f32
    latent_ref[...] = latent                                          # unmasked store

    # dropout(p=0.1) is identity in eval mode.
    # TODO(synk): train-mode dropout via pltpu.prng_seed / stateful_bernoulli if needed.
    z = latent + emb_ref[...]                                         # (tb, lp) f32

    # --- decoder: Linear -> Tanh x3, final Linear ---
    h = jnp.tanh(dense(z, dw1, db1))
    h = jnp.tanh(dense(h, dw2, db2))
    h = jnp.tanh(dense(h, dw3, db3))
    logits = dense(h, dw4, db4)
    logits_ref[...] = logits                                          # (tb, dim) f32

    # --- per-row sum of squared errors, stored lane-dense ---
    # A (tb, 1) output would force masked vst.msk partial stores; broadcasting the
    # per-row SSE across 128 lanes keeps the store unmasked (column 0 read outside).
    diff = logits - x
    row_sse = jnp.sum(diff * diff, axis=-1, keepdims=True)            # (tb, 1)
    sse_ref[...] = jnp.broadcast_to(row_sse, sse_ref.shape)           # (tb, 128)


# ------------------------------- wrapper -------------------------------------
def _pick_batch_tile(batch):
    # Big tiles amortize the ~0.35us/step grid overhead and fill MXU rows, but keep
    # >=2 tiles so v7x's two TensorCores both get work.  Round to a sublane multiple
    # (8) rather than a power of two so ragged batches waste <=7 rows per tile.
    half = pl.cdiv(batch, 2)
    tb = min(256, max(8, half))
    return int(pl.cdiv(tb, 8) * 8)


def autoencoder_forward(params, user_ids, user_inputs, *, tb=None):
    B, dim = user_inputs.shape
    latent_dim = params["emb_table"].shape[1]
    lp = int(pl.cdiv(latent_dim, 128) * 128)        # lane-dense latent width

    if tb is None:
        tb = _pick_batch_tile(B)
    num_tiles = pl.cdiv(B, tb)
    B_pad = num_tiles * tb

    # Embedding lookup (glue) + pad batch to a tile multiple and latent to 128 lanes.
    user_embeds = jnp.take(params["emb_table"], user_ids, axis=0)     # (B, latent)
    emb_in = jnp.pad(user_embeds, ((0, B_pad - B), (0, lp - latent_dim)))
    x_in = user_inputs if B_pad == B else jnp.pad(user_inputs, ((0, B_pad - B), (0, 0)))

    enc = list(params["encoder"])   # list of (W[in,out], b[1,out])
    dec = list(params["decoder"])
    if lp != latent_dim:
        # Zero-pad latent-facing weights: extra latent columns stay exactly zero and
        # the extra dw1 rows multiply those zeros, so the decoder output is unchanged.
        w4, b4 = enc[3]
        enc[3] = (jnp.pad(w4, ((0, 0), (0, lp - latent_dim))),
                  jnp.pad(b4, ((0, 0), (0, lp - latent_dim))))
        w1, b1 = dec[0]
        dec[0] = (jnp.pad(w1, ((0, lp - latent_dim), (0, 0))), b1)

    weight_args = []
    weight_specs = []
    for (w, b) in enc + dec:
        weight_args += [w, b]
        # Constant (0,0) index map: block is resident across the whole grid (no
        # per-step re-DMA).  Full weight set is ~1-3 MiB at these shapes, so the
        # default double-buffering headroom is a non-issue.
        weight_specs += [
            pl.BlockSpec(w.shape, lambda i: (0, 0)),
            pl.BlockSpec(b.shape, lambda i: (0, 0)),
        ]

    grid = (num_tiles,)
    in_specs = [
        pl.BlockSpec((tb, lp), lambda i: (i, 0)),           # user_embeds (lane-padded)
        pl.BlockSpec((tb, dim), lambda i: (i, 0)),          # user_inputs
    ] + weight_specs

    out_shape = (
        jax.ShapeDtypeStruct((B_pad, lp), jnp.float32),     # latent (lane-padded)
        jax.ShapeDtypeStruct((B_pad, dim), jnp.float32),    # logits
        jax.ShapeDtypeStruct((B_pad, 128), jnp.float32),    # per-row SSE (lane-dense)
    )
    out_specs = (
        pl.BlockSpec((tb, lp), lambda i: (i, 0)),
        pl.BlockSpec((tb, dim), lambda i: (i, 0)),
        pl.BlockSpec((tb, 128), lambda i: (i, 0)),
    )

    latent, logits, sse = pl.pallas_call(
        ae_kernel,
        out_shape=out_shape,
        grid_spec=pltpu.PrefetchScalarGridSpec(
            num_scalar_prefetch=0,
            grid=grid,
            in_specs=in_specs,
            out_specs=out_specs,
        ),
        compiler_params=pltpu.CompilerParams(
            dimension_semantics=("parallel",),   # megacore: shard batch tiles over TCs
            vmem_limit_bytes=48 << 20,           # fits v7x's 64 MiB physical VMEM
        ),
    )(emb_in, x_in, *weight_args)

    latent = latent[:B, :latent_dim]              # strip batch + lane padding
    logits = logits[:B]
    sse = sse[:B, 0]                              # padded rows discarded here

    loss = jnp.sum(sse) / (B * dim)   # nn.MSELoss default: mean over all elements
    return {
        "user_embeds": user_embeds,
        "latent_embeds": latent,
        "logits": logits,
        "loss": loss,
    }


# --------------------------- deterministic init -------------------------------
def init_params(key, dim, latent_dim, entity_size, hidden_dims=(512, 256, 128),
                weight_dtype=jnp.bfloat16):
    assert latent_dim < hidden_dims[2], "incorrect AE dimension setting"

    def linear(key, fan_in, fan_out):
        kw, kb = jax.random.split(key)
        bound = 1.0 / jnp.sqrt(fan_in)
        w = jax.random.uniform(kw, (fan_in, fan_out), jnp.float32, -bound, bound)
        b = jax.random.uniform(kb, (1, fan_out), jnp.float32, -bound, bound)
        # bf16 weights: half the DMA bytes and bf16 MXU rate on v6e/v7x; the kernel
        # accumulates in f32 and keeps biases / elementwise math in f32.
        return w.astype(weight_dtype), b

    keys = jax.random.split(key, 10)
    emb_table = jax.random.normal(keys[0], (entity_size, latent_dim), jnp.float32)

    enc_dims = [dim, hidden_dims[0], hidden_dims[1], hidden_dims[2], latent_dim]
    dec_dims = enc_dims[::-1]
    encoder = [linear(keys[1 + i], enc_dims[i], enc_dims[i + 1]) for i in range(4)]
    decoder = [linear(keys[5 + i], dec_dims[i], dec_dims[i + 1]) for i in range(4)]
    return {"emb_table": emb_table, "encoder": encoder, "decoder": decoder}


# ------------------------------ reference (JAX) -------------------------------
def reference_forward(params, user_ids, user_inputs):
    """Pure-JAX reference using the same precision policy as the kernel
    (bf16 matmul operands, f32 accumulation, f32 elementwise)."""
    emb = jnp.take(params["emb_table"], user_ids, axis=0)

    def dense(h, w, b):
        return jnp.dot(h.astype(w.dtype), w, preferred_element_type=jnp.float32) + b

    h = user_inputs
    for i, (w, b) in enumerate(params["encoder"]):
        h = dense(h, w, b)
        if i < 3:
            h = jnp.tanh(h)
    latent = h
    h = latent + emb
    for i, (w, b) in enumerate(params["decoder"]):
        h = dense(h, w, b)
        if i < 3:
            h = jnp.tanh(h)
    loss = jnp.mean((h - user_inputs) ** 2)
    return latent, h, loss


if __name__ == "__main__":
    # Small-but-consistent shapes: dim=256, hidden=(512,256,128), latent=64 (<128).
    B, DIM, LATENT, ENTITY = 16, 256, 64, 100
    key = jax.random.PRNGKey(0)
    k_param, k_ids, k_in = jax.random.split(key, 3)

    params = init_params(k_param, DIM, LATENT, ENTITY)
    user_ids = jax.random.randint(k_ids, (B,), 0, ENTITY)
    user_inputs = jax.random.normal(k_in, (B, DIM), jnp.float32)

    fwd = jax.jit(autoencoder_forward)
    out = fwd(params, user_ids, user_inputs)
    jax.block_until_ready(out)

    ref_latent, ref_logits, ref_loss = reference_forward(params, user_ids, user_inputs)
    assert jnp.allclose(out["latent_embeds"], ref_latent, atol=5e-3, rtol=5e-3)
    assert jnp.allclose(out["logits"], ref_logits, atol=5e-3, rtol=5e-3)
    assert jnp.allclose(out["loss"], ref_loss, atol=1e-4, rtol=1e-3)

    # Second case: ragged batch (not a tile multiple) exercises the pad-and-slice
    # path with a sublane-rounded tile (tb=152, grid=2, only 4 padded rows).
    B2 = 300
    k_ids2, k_in2 = jax.random.split(jax.random.PRNGKey(1))
    user_ids2 = jax.random.randint(k_ids2, (B2,), 0, ENTITY)
    user_inputs2 = jax.random.normal(k_in2, (B2, DIM), jnp.float32)
    out2 = fwd(params, user_ids2, user_inputs2)
    jax.block_until_ready(out2)

    ref_latent2, ref_logits2, ref_loss2 = reference_forward(params, user_ids2, user_inputs2)
    assert jnp.allclose(out2["latent_embeds"], ref_latent2, atol=5e-3, rtol=5e-3)
    assert jnp.allclose(out2["logits"], ref_logits2, atol=5e-3, rtol=5e-3)
    assert jnp.allclose(out2["loss"], ref_loss2, atol=1e-4, rtol=1e-3)

    print("KERNEL_OK")
</pallas_src>

<mosaic_0001>
module attributes {stable_mosaic.version = 11 : i64} {
  func.func @ae_kernel(%arg0: i32, %arg1: memref<8x128xf32, #tpu.memory_space<vmem>>, %arg2: memref<8x256xf32, #tpu.memory_space<vmem>>, %arg3: memref<256x512xbf16, #tpu.memory_space<vmem>>, %arg4: memref<1x512xf32, #tpu.memory_space<vmem>>, %arg5: memref<512x256xbf16, #tpu.memory_space<vmem>>, %arg6: memref<1x256xf32, #tpu.memory_space<vmem>>, %arg7: memref<256x128xbf16, #tpu.memory_space<vmem>>, %arg8: memref<1x128xf32, #tpu.memory_space<vmem>>, %arg9: memref<128x128xbf16, #tpu.memory_space<vmem>>, %arg10: memref<1x128xf32, #tpu.memory_space<vmem>>, %arg11: memref<128x128xbf16, #tpu.memory_space<vmem>>, %arg12: memref<1x128xf32, #tpu.memory_space<vmem>>, %arg13: memref<128x256xbf16, #tpu.memory_space<vmem>>, %arg14: memref<1x256xf32, #tpu.memory_space<vmem>>, %arg15: memref<256x512xbf16, #tpu.memory_space<vmem>>, %arg16: memref<1x512xf32, #tpu.memory_space<vmem>>, %arg17: memref<512x256xbf16, #tpu.memory_space<vmem>>, %arg18: memref<1x256xf32, #tpu.memory_space<vmem>>, %arg19: memref<8x128xf32, #tpu.memory_space<vmem>>, %arg20: memref<8x256xf32, #tpu.memory_space<vmem>>, %arg21: memref<8x128xf32, #tpu.memory_space<vmem>>) attributes {dimension_semantics = [#tpu.dimension_semantics<parallel>], iteration_bounds = array<i64: 2>, scalar_prefetch = 0 : i64, scratch_operands = 0 : i64, tpu.core_type = #tpu.core_type<tc>, window_params = [{transform_indices = @transform_0, window_bounds = array<i64: 8, 128>}, {transform_indices = @transform_1, window_bounds = array<i64: 8, 256>}, {pipeline_mode = #tpu.pipeline_mode<synchronous>, transform_indices = @transform_2, window_bounds = array<i64: 256, 512>}, {pipeline_mode = #tpu.pipeline_mode<synchronous>, transform_indices = @transform_3, window_bounds = array<i64: 1, 512>}, {pipeline_mode = #tpu.pipeline_mode<synchronous>, transform_indices = @transform_4, window_bounds = array<i64: 512, 256>}, {pipeline_mode = #tpu.pipeline_mode<synchronous>, transform_indices = @transform_5, window_bounds = array<i64: 1, 256>}, {pipeline_mode = #tpu.pipeline_mode<synchronous>, transform_indices = @transform_6, window_bounds = array<i64: 256, 128>}, {pipeline_mode = #tpu.pipeline_mode<synchronous>, transform_indices = @transform_7, window_bounds = array<i64: 1, 128>}, {pipeline_mode = #tpu.pipeline_mode<synchronous>, transform_indices = @transform_8, window_bounds = array<i64: 128, 128>}, {pipeline_mode = #tpu.pipeline_mode<synchronous>, transform_indices = @transform_9, window_bounds = array<i64: 1, 128>}, {pipeline_mode = #tpu.pipeline_mode<synchronous>, transform_indices = @transform_10, window_bounds = array<i64: 128, 128>}, {pipeline_mode = #tpu.pipeline_mode<synchronous>, transform_indices = @transform_11, window_bounds = array<i64: 1, 128>}, {pipeline_mode = #tpu.pipeline_mode<synchronous>, transform_indices = @transform_12, window_bounds = array<i64: 128, 256>}, {pipeline_mode = #tpu.pipeline_mode<synchronous>, transform_indices = @transform_13, window_bounds = array<i64: 1, 256>}, {pipeline_mode = #tpu.pipeline_mode<synchronous>, transform_indices = @transform_14, window_bounds = array<i64: 256, 512>}, {pipeline_mode = #tpu.pipeline_mode<synchronous>, transform_indices = @transform_15, window_bounds = array<i64: 1, 512>}, {pipeline_mode = #tpu.pipeline_mode<synchronous>, transform_indices = @transform_16, window_bounds = array<i64: 512, 256>}, {pipeline_mode = #tpu.pipeline_mode<synchronous>, transform_indices = @transform_17, window_bounds = array<i64: 1, 256>}, {transform_indices = @transform_18, window_bounds = array<i64: 8, 128>}, {transform_indices = @transform_19, window_bounds = array<i64: 8, 256>}, {transform_indices = @transform_20, window_bounds = array<i64: 8, 128>}]} {
    %c0 = arith.constant 0 : index
    %c0_0 = arith.constant 0 : index
    %0 = vector.load %arg2[%c0, %c0_0] : memref<8x256xf32, #tpu.memory_space<vmem>>, vector<8x256xf32>
    %1 = arith.truncf %0 : vector<8x256xf32> to vector<8x256xbf16>
    %c0_1 = arith.constant 0 : index
    %c0_2 = arith.constant 0 : index
    %2 = vector.load %arg3[%c0_1, %c0_2] : memref<256x512xbf16, #tpu.memory_space<vmem>>, vector<256x512xbf16>
    %cst = arith.constant dense<0.000000e+00> : vector<8x512xf32>
    %3 = tpu.matmul %1, %2, %cst {dimension_numbers = #tpu.dot_dimension_numbers<[1], [0], [0], [1], [0, 0, 1, 1], [], []>} : vector<8x256xbf16>, vector<256x512xbf16>, vector<8x512xf32> -> vector<8x512xf32>
    %c0_3 = arith.constant 0 : index
    %c0_4 = arith.constant 0 : index
    %4 = vector.load %arg4[%c0_3, %c0_4] : memref<1x512xf32, #tpu.memory_space<vmem>>, vector<1x512xf32>
    %5 = vector.broadcast %4 : vector<1x512xf32> to vector<8x512xf32>
    %6 = arith.addf %3, %5 : vector<8x512xf32>
    %7 = math.tanh %6 : vector<8x512xf32>
    %8 = arith.truncf %7 : vector<8x512xf32> to vector<8x512xbf16>
    %c0_5 = arith.constant 0 : index
    %c0_6 = arith.constant 0 : index
    %9 = vector.load %arg5[%c0_5, %c0_6] : memref<512x256xbf16, #tpu.memory_space<vmem>>, vector<512x256xbf16>
    %cst_7 = arith.constant dense<0.000000e+00> : vector<8x256xf32>
    %10 = tpu.matmul %8, %9, %cst_7 {dimension_numbers = #tpu.dot_dimension_numbers<[1], [0], [0], [1], [0, 0, 1, 1], [], []>} : vector<8x512xbf16>, vector<512x256xbf16>, vector<8x256xf32> -> vector<8x256xf32>
    %c0_8 = arith.constant 0 : index
    %c0_9 = arith.constant 0 : index
    %11 = vector.load %arg6[%c0_8, %c0_9] : memref<1x256xf32, #tpu.memory_space<vmem>>, vector<1x256xf32>
    %12 = vector.broadcast %11 : vector<1x256xf32> to vector<8x256xf32>
    %13 = arith.addf %10, %12 : vector<8x256xf32>
    %14 = math.tanh %13 : vector<8x256xf32>
    %15 = arith.truncf %14 : vector<8x256xf32> to vector<8x256xbf16>
    %c0_10 = arith.constant 0 : index
    %c0_11 = arith.constant 0 : index
    %16 = vector.load %arg7[%c0_10, %c0_11] : memref<256x128xbf16, #tpu.memory_space<vmem>>, vector<256x128xbf16>
    %cst_12 = arith.constant dense<0.000000e+00> : vector<8x128xf32>
    %17 = tpu.matmul %15, %16, %cst_12 {dimension_numbers = #tpu.dot_dimension_numbers<[1], [0], [0], [1], [0, 0, 1, 1], [], []>} : vector<8x256xbf16>, vector<256x128xbf16>, vector<8x128xf32> -> vector<8x128xf32>
    %c0_13 = arith.constant 0 : index
    %c0_14 = arith.constant 0 : index
    %18 = vector.load %arg8[%c0_13, %c0_14] : memref<1x128xf32, #tpu.memory_space<vmem>>, vector<1x128xf32>
    %19 = vector.broadcast %18 : vector<1x128xf32> to vector<8x128xf32>
    %20 = arith.addf %17, %19 : vector<8x128xf32>
    %21 = math.tanh %20 : vector<8x128xf32>
    %22 = arith.truncf %21 : vector<8x128xf32> to vector<8x128xbf16>
    %c0_15 = arith.constant 0 : index
    %c0_16 = arith.constant 0 : index
    %23 = vector.load %arg9[%c0_15, %c0_16] : memref<128x128xbf16, #tpu.memory_space<vmem>>, vector<128x128xbf16>
    %cst_17 = arith.constant dense<0.000000e+00> : vector<8x128xf32>
    %24 = tpu.matmul %22, %23, %cst_17 {dimension_numbers = #tpu.dot_dimension_numbers<[1], [0], [0], [1], [0, 0, 1, 1], [], []>} : vector<8x128xbf16>, vector<128x128xbf16>, vector<8x128xf32> -> vector<8x128xf32>
    %c0_18 = arith.constant 0 : index
    %c0_19 = arith.constant 0 : index
    %25 = vector.load %arg10[%c0_18, %c0_19] : memref<1x128xf32, #tpu.memory_space<vmem>>, vector<1x128xf32>
    %26 = vector.broadcast %25 : vector<1x128xf32> to vector<8x128xf32>
    %27 = arith.addf %24, %26 : vector<8x128xf32>
    %c0_20 = arith.constant 0 : index
    %c0_21 = arith.constant 0 : index
    %28 = vector.load %arg19[%c0_20, %c0_21] : memref<8x128xf32, #tpu.memory_space<vmem>>, vector<8x128xf32>
    tpu.vector_store %arg19[%c0_20, %c0_21], %27 {strides = array<i32>} : memref<8x128xf32, #tpu.memory_space<vmem>>, vector<8x128xf32>,
    %c0_22 = arith.constant 0 : index
    %c0_23 = arith.constant 0 : index
    %29 = vector.load %arg1[%c0_22, %c0_23] : memref<8x128xf32, #tpu.memory_space<vmem>>, vector<8x128xf32>
    %30 = arith.addf %27, %29 : vector<8x128xf32>
    %31 = arith.truncf %30 : vector<8x128xf32> to vector<8x128xbf16>
    %c0_24 = arith.constant 0 : index
    %c0_25 = arith.constant 0 : index
    %32 = vector.load %arg11[%c0_24, %c0_25] : memref<128x128xbf16, #tpu.memory_space<vmem>>, vector<128x128xbf16>
    %cst_26 = arith.constant dense<0.000000e+00> : vector<8x128xf32>
    %33 = tpu.matmul %31, %32, %cst_26 {dimension_numbers = #tpu.dot_dimension_numbers<[1], [0], [0], [1], [0, 0, 1, 1], [], []>} : vector<8x128xbf16>, vector<128x128xbf16>, vector<8x128xf32> -> vector<8x128xf32>
    %c0_27 = arith.constant 0 : index
    %c0_28 = arith.constant 0 : index
    %34 = vector.load %arg12[%c0_27, %c0_28] : memref<1x128xf32, #tpu.memory_space<vmem>>, vector<1x128xf32>
    %35 = vector.broadcast %34 : vector<1x128xf32> to vector<8x128xf32>
    %36 = arith.addf %33, %35 : vector<8x128xf32>
    %37 = math.tanh %36 : vector<8x128xf32>
    %38 = arith.truncf %37 : vector<8x128xf32> to vector<8x128xbf16>
    %c0_29 = arith.constant 0 : index
    %c0_30 = arith.constant 0 : index
    %39 = vector.load %arg13[%c0_29, %c0_30] : memref<128x256xbf16, #tpu.memory_space<vmem>>, vector<128x256xbf16>
    %cst_31 = arith.constant dense<0.000000e+00> : vector<8x256xf32>
    %40 = tpu.matmul %38, %39, %cst_31 {dimension_numbers = #tpu.dot_dimension_numbers<[1], [0], [0], [1], [0, 0, 1, 1], [], []>} : vector<8x128xbf16>, vector<128x256xbf16>, vector<8x256xf32> -> vector<8x256xf32>
    %c0_32 = arith.constant 0 : index
    %c0_33 = arith.constant 0 : index
    %41 = vector.load %arg14[%c0_32, %c0_33] : memref<1x256xf32, #tpu.memory_space<vmem>>, vector<1x256xf32>
    %42 = vector.broadcast %41 : vector<1x256xf32> to vector<8x256xf32>
    %43 = arith.addf %40, %42 : vector<8x256xf32>
    %44 = math.tanh %43 : vector<8x256xf32>
    %45 = arith.truncf %44 : vector<8x256xf32> to vector<8x256xbf16>
    %c0_34 = arith.constant 0 : index
    %c0_35 = arith.constant 0 : index
    %46 = vector.load %arg15[%c0_34, %c0_35] : memref<256x512xbf16, #tpu.memory_space<vmem>>, vector<256x512xbf16>
    %cst_36 = arith.constant dense<0.000000e+00> : vector<8x512xf32>
    %47 = tpu.matmul %45, %46, %cst_36 {dimension_numbers = #tpu.dot_dimension_numbers<[1], [0], [0], [1], [0, 0, 1, 1], [], []>} : vector<8x256xbf16>, vector<256x512xbf16>, vector<8x512xf32> -> vector<8x512xf32>
    %c0_37 = arith.constant 0 : index
    %c0_38 = arith.constant 0 : index
    %48 = vector.load %arg16[%c0_37, %c0_38] : memref<1x512xf32, #tpu.memory_space<vmem>>, vector<1x512xf32>
    %49 = vector.broadcast %48 : vector<1x512xf32> to vector<8x512xf32>
    %50 = arith.addf %47, %49 : vector<8x512xf32>
    %51 = math.tanh %50 : vector<8x512xf32>
    %52 = arith.truncf %51 : vector<8x512xf32> to vector<8x512xbf16>
    %c0_39 = arith.constant 0 : index
    %c0_40 = arith.constant 0 : index
    %53 = vector.load %arg17[%c0_39, %c0_40] : memref<512x256xbf16, #tpu.memory_space<vmem>>, vector<512x256xbf16>
    %cst_41 = arith.constant dense<0.000000e+00> : vector<8x256xf32>
    %54 = tpu.matmul %52, %53, %cst_41 {dimension_numbers = #tpu.dot_dimension_numbers<[1], [0], [0], [1], [0, 0, 1, 1], [], []>} : vector<8x512xbf16>, vector<512x256xbf16>, vector<8x256xf32> -> vector<8x256xf32>
    %c0_42 = arith.constant 0 : index
    %c0_43 = arith.constant 0 : index
    %55 = vector.load %arg18[%c0_42, %c0_43] : memref<1x256xf32, #tpu.memory_space<vmem>>, vector<1x256xf32>
    %56 = vector.broadcast %55 : vector<1x256xf32> to vector<8x256xf32>
    %57 = arith.addf %54, %56 : vector<8x256xf32>
    %c0_44 = arith.constant 0 : index
    %c0_45 = arith.constant 0 : index
    %58 = vector.load %arg20[%c0_44, %c0_45] : memref<8x256xf32, #tpu.memory_space<vmem>>, vector<8x256xf32>
    tpu.vector_store %arg20[%c0_44, %c0_45], %57 {strides = array<i32>} : memref<8x256xf32, #tpu.memory_space<vmem>>, vector<8x256xf32>,
    %59 = arith.subf %57, %0 : vector<8x256xf32>
    %60 = arith.mulf %59, %59 : vector<8x256xf32>
    %cst_46 = arith.constant dense<0.000000e+00> : vector<8xf32>
    %61 = vector.multi_reduction <add>, %60, %cst_46 [1] : vector<8x256xf32> to vector<8xf32>
    %62 = vector.shape_cast %61 : vector<8xf32> to vector<8x1xf32>
    %63 = vector.shape_cast %62 : vector<8x1xf32> to vector<8x1xf32>
    %64 = vector.broadcast %63 : vector<8x1xf32> to vector<8x128xf32>
    %c0_47 = arith.constant 0 : index
    %c0_48 = arith.constant 0 : index
    %65 = vector.load %arg21[%c0_47, %c0_48] : memref<8x128xf32, #tpu.memory_space<vmem>>, vector<8x128xf32>
    tpu.vector_store %arg21[%c0_47, %c0_48], %64 {strides = array<i32>} : memref<8x128xf32, #tpu.memory_space<vmem>>, vector<8x128xf32>,
    return
  }
  func.func @transform_0(%arg0: i32) -> (i32, i32) {
    %c0_i32 = arith.constant 0 : i32
    %c0_i32_0 = arith.constant 0 : i32
    return %arg0, %c0_i32 : i32, i32
  }
  func.func @transform_1(%arg0: i32) -> (i32, i32) {
    %c0_i32 = arith.constant 0 : i32
    %c0_i32_0 = arith.constant 0 : i32
    return %arg0, %c0_i32 : i32, i32
  }
  func.func @transform_2(%arg0: i32) -> (i32, i32) {
    %c0_i32 = arith.constant 0 : i32
    %c0_i32_0 = arith.constant 0 : i32
    %c0_i32_1 = arith.constant 0 : i32
    return %c0_i32, %c0_i32_0 : i32, i32
  }
  func.func @transform_3(%arg0: i32) -> (i32, i32) {
    %c0_i32 = arith.constant 0 : i32
    %c0_i32_0 = arith.constant 0 : i32
    %c0_i32_1 = arith.constant 0 : i32
    return %c0_i32, %c0_i32_0 : i32, i32
  }
  func.func @transform_4(%arg0: i32) -> (i32, i32) {
    %c0_i32 = arith.constant 0 : i32
    %c0_i32_0 = arith.constant 0 : i32
    %c0_i32_1 = arith.constant 0 : i32
    return %c0_i32, %c0_i32_0 : i32, i32
  }
  func.func @transform_5(%arg0: i32) -> (i32, i32) {
    %c0_i32 = arith.constant 0 : i32
    %c0_i32_0 = arith.constant 0 : i32
    %c0_i32_1 = arith.constant 0 : i32
    return %c0_i32, %c0_i32_0 : i32, i32
  }
  func.func @transform_6(%arg0: i32) -> (i32, i32) {
    %c0_i32 = arith.constant 0 : i32
    %c0_i32_0 = arith.constant 0 : i32
    %c0_i32_1 = arith.constant 0 : i32
    return %c0_i32, %c0_i32_0 : i32, i32
  }
  func.func @transform_7(%arg0: i32) -> (i32, i32) {
    %c0_i32 = arith.constant 0 : i32
    %c0_i32_0 = arith.constant 0 : i32
    %c0_i32_1 = arith.constant 0 : i32
    return %c0_i32, %c0_i32_0 : i32, i32
  }
  func.func @transform_8(%arg0: i32) -> (i32, i32) {
    %c0_i32 = arith.constant 0 : i32
    %c0_i32_0 = arith.constant 0 : i32
    %c0_i32_1 = arith.constant 0 : i32
    return %c0_i32, %c0_i32_0 : i32, i32
  }
  func.func @transform_9(%arg0: i32) -> (i32, i32) {
    %c0_i32 = arith.constant 0 : i32
    %c0_i32_0 = arith.constant 0 : i32
    %c0_i32_1 = arith.constant 0 : i32
    return %c0_i32, %c0_i32_0 : i32, i32
  }
  func.func @transform_10(%arg0: i32) -> (i32, i32) {
    %c0_i32 = arith.constant 0 : i32
    %c0_i32_0 = arith.constant 0 : i32
    %c0_i32_1 = arith.constant 0 : i32
    return %c0_i32, %c0_i32_0 : i32, i32
  }
  func.func @transform_11(%arg0: i32) -> (i32, i32) {
    %c0_i32 = arith.constant 0 : i32
    %c0_i32_0 = arith.constant 0 : i32
    %c0_i32_1 = arith.constant 0 : i32
    return %c0_i32, %c0_i32_0 : i32, i32
  }
  func.func @transform_12(%arg0: i32) -> (i32, i32) {
    %c0_i32 = arith.constant 0 : i32
    %c0_i32_0 = arith.constant 0 : i32
    %c0_i32_1 = arith.constant 0 : i32
    return %c0_i32, %c0_i32_0 : i32, i32
  }
  func.func @transform_13(%arg0: i32) -> (i32, i32) {
    %c0_i32 = arith.constant 0 : i32
    %c0_i32_0 = arith.constant 0 : i32
    %c0_i32_1 = arith.constant 0 : i32
    return %c0_i32, %c0_i32_0 : i32, i32
  }
  func.func @transform_14(%arg0: i32) -> (i32, i32) {
    %c0_i32 = arith.constant 0 : i32
    %c0_i32_0 = arith.constant 0 : i32
    %c0_i32_1 = arith.constant 0 : i32
    return %c0_i32, %c0_i32_0 : i32, i32
  }
  func.func @transform_15(%arg0: i32) -> (i32, i32) {
    %c0_i32 = arith.constant 0 : i32
    %c0_i32_0 = arith.constant 0 : i32
    %c0_i32_1 = arith.constant 0 : i32
    return %c0_i32, %c0_i32_0 : i32, i32
  }
  func.func @transform_16(%arg0: i32) -> (i32, i32) {
    %c0_i32 = arith.constant 0 : i32
    %c0_i32_0 = arith.constant 0 : i32
    %c0_i32_1 = arith.constant 0 : i32
    return %c0_i32, %c0_i32_0 : i32, i32
  }
  func.func @transform_17(%arg0: i32) -> (i32, i32) {
    %c0_i32 = arith.constant 0 : i32
    %c0_i32_0 = arith.constant 0 : i32
    %c0_i32_1 = arith.constant 0 : i32
    return %c0_i32, %c0_i32_0 : i32, i32
  }
  func.func @transform_18(%arg0: i32) -> (i32, i32) {
    %c0_i32 = arith.constant 0 : i32
    %c0_i32_0 = arith.constant 0 : i32
    return %arg0, %c0_i32 : i32, i32
  }
  func.func @transform_19(%arg0: i32) -> (i32, i32) {
    %c0_i32 = arith.constant 0 : i32
    %c0_i32_0 = arith.constant 0 : i32
    return %arg0, %c0_i32 : i32, i32
  }
  func.func @transform_20(%arg0: i32) -> (i32, i32) {
    %c0_i32 = arith.constant 0 : i32
    %c0_i32_0 = arith.constant 0 : i32
    return %arg0, %c0_i32 : i32, i32
  }
}

</mosaic_0001>

<bundles_post_ra>
// kernel: autoencoder_forward.1
= control target key start
LH: loop header
LB: loop body
LE: loop exit
PB: predicated region body
PF: predicated region fallthrough
CT: control target
= control target key end

     0   :  { %s5441_s0 = inlined_call_operand.vmem [shape: f32[16,128], index: 0, kind: input, shape index: {}]   ;;  %s5442_s1 = inlined_call_operand.hbm [shape: f32[16,256], index: 1, kind: input, shape index: {}]   ;;  %s5443_s2 = inlined_call_operand.vmem [shape: bf16[256,512], index: 2, kind: input, shape index: {}]   ;;  %s5444_s3 = inlined_call_operand.vmem [shape: f32[1,512], index: 3, kind: input, shape index: {}]   ;;  %s5445_s4 = inlined_call_operand.hbm [shape: bf16[512,256], index: 4, kind: input, shape index: {}]   ;;  %s5446_s5 = inlined_call_operand.vmem [shape: f32[1,256], index: 5, kind: input, shape index: {}]   ;;  %s5447_s6 = inlined_call_operand.vmem [shape: bf16[256,128], index: 6, kind: input, shape index: {}]   ;;  %s5448_s7 = inlined_call_operand.vmem [shape: f32[1,128], index: 7, kind: input, shape index: {}]   ;;  %s5449_s8 = inlined_call_operand.vmem [shape: bf16[128,128], index: 8, kind: input, shape index: {}]   ;;  %s5450_s9 = inlined_call_operand.vmem [shape: f32[1,128], index: 9, kind: input, shape index: {}]   ;;  %s5451_s10 = inlined_call_operand.vmem [shape: bf16[128,128], index: 10, kind: input, shape index: {}]   ;;  %s5452_s11 = inlined_call_operand.vmem [shape: f32[1,128], index: 11, kind: input, shape index: {}]   ;;  %s5453_s12 = inlined_call_operand.hbm [shape: bf16[128,256], index: 12, kind: input, shape index: {}]   ;;  %s5454_s13 = inlined_call_operand.vmem [shape: f32[1,256], index: 13, kind: input, shape index: {}]   ;;  %s5455_s14 = inlined_call_operand.hbm [shape: bf16[256,512], index: 14, kind: input, shape index: {}]   ;;  %s5456_s15 = inlined_call_operand.vmem [shape: f32[1,512], index: 15, kind: input, shape index: {}]   ;;  %s5457_s16 = inlined_call_operand.hbm [shape: bf16[512,256], index: 16, kind: input, shape index: {}]   ;;  %s5458_s17 = inlined_call_operand.vmem [shape: f32[1,256], index: 17, kind: input, shape index: {}]   ;;  %s5459_s18 = inlined_call_operand.hbm [shape: f32[16,128], index: 18, kind: output, shape index: {0}]   ;;  %s5460_s19 = inlined_call_operand.hbm [shape: f32[16,256], index: 19, kind: output, shape index: {1}]   ;;  %s5461_s20 = inlined_call_operand.vmem [shape: f32[16,128], index: 20, kind: output, shape index: {2}]  }
   0x1   :  { %5476 = sst [smem:[#allocation24_spill]] %s5441_s0 }
   0x2   :  { %5477 = sst [smem:[#allocation25_spill]] %s5442_s1 }
   0x3   :  { %5478 = sst [smem:[#allocation26_spill]] %s5443_s2 }
   0x4   :  { %5479 = sst [smem:[#allocation27_spill]] %s5444_s3 }
   0x5   :  { %5480 = sst [smem:[#allocation28_spill]] %s5445_s4 }
   0x6   :  { %5481 = sst [smem:[#allocation29_spill]] %s5446_s5 }
   0x7   :  { %5482 = sst [smem:[#allocation30_spill]] %s5447_s6 }
   0x8   :  { %5483 = sst [smem:[#allocation31_spill]] %s5448_s7 }
   0x9   :  { %5484 = sst [smem:[#allocation32_spill]] %s5453_s12 }
   0xa   :  { %5485 = sst [smem:[#allocation33_spill]] %s5455_s14 }
   0xb   :  { %5486 = sst [smem:[#allocation34_spill]] %s5457_s16 }
   0xc   :  { %5487 = sst [smem:[#allocation35_spill]] %s5459_s18 }
   0xd   :  { %5488 = sst [smem:[#allocation36_spill]] %s5460_s19 }
   0xe   :  { %5489 = sst [smem:[#allocation37_spill]] %s5461_s20 }
   0xf   :  { %26 = vsyncpa [#allocation3], 0 }
  0x10   :  { %28 = vsyncpa [#allocation3 + $0x1], 0 }
  0x11   :  { %29 = vsyncpa [#allocation6], 0 }
  0x12   :  { %30 = vsyncpa [#allocation9], 0 }
  0x13   :  { %31 = vsyncpa [#allocation4], 0 }
  0x14   :  { %33 = vsyncpa [#allocation4 + $0x1], 0 }
  0x15   :  { %34 = vsyncpa [#allocation13], 0 }
  0x16   :  { %36 = vsyncpa [#allocation13 + $0x1], 0  ;;  %s4823_s1 = smov 0   ;;  %s4825_s22 = smov 0  }
  0x17   :  { %s4827_s23 = smov 0   ;;  %s4829_s24 = smov 0  }
  0x18 LB: > { %5490 = sst [smem:[#allocation19_spill]] %s4698_s23  ;;  %s4704_s2 = smov [#allocation5]   ;;  %s4702_s24 = sphi %s4829_s24, %s5530_s24   ;;  %s4698_s23 = sphi %s4827_s23, %s5532_s23   ;;  %s4694_s22 = sphi %s4825_s22, %s5534_s22   ;;  %s4690_s1 = sphi %s4823_s1, %s5533_s1  }
  0x19   : > { %5491 = sst [smem:[#allocation20_spill]] %s4702_s24  ;;  %s531_s25 = sshll.u32 %s4704_s2, 4  ;;  %s532_s25 = int_to_ptr.vmem [resolvable:$true] %s531_s25 }
  0x1a   : > { %s4844_s3 = sadd.s32 4294967295, %s4702_s24   ;;  %p3484_p0 = scmp.ge.s32.totalorder %s4702_s24, 1 }
  0x1b   : > { %p5469_p1 = scmp.eq.s32.totalorder %s4844_s3, 0  ;;  %p513_p2 = scmp.lt.s32.totalorder %s4702_s24, 3 }
  0x1c   : > { %s4705_s27 = smov [#allocation8]   ;;  %s4706_s29 = smov [#allocation7]  }
  0x1d   : > { %p4849_p3 = pnand %p3484_p0, %p513_p2  ;;  %s581_s28 = sshll.u32 %s4705_s27, 4  ;;  %s4862_s28 = int_to_ptr.vmem [resolvable:$true] %s581_s28 }
  0x1e   : > { %s4864_s30 = sshll.u32 %s4706_s29, 4  ;;  %s4479_s0 = scalar_lea.vmem %s532_s25, 8192  ;;  %s566_s30 = int_to_ptr.vmem [resolvable:$true] %s4864_s30 }
  0x1f   : > { %s5492_s26 = scalar_select %p4849_p3, 1, 0 }
  0x20   : > { %p3921_p5 = pneg %p4849_p3  ;;  %p4480_p8 = scmp.ne.s32.totalorder %s532_s25, %s4479_s0 }
  0x21   : > { %p4487_p11 = scmp.lt.s32.totalorder %s532_s25, %s532_s25  ;;  %p4488_p12 = scmp.lt.s32.totalorder %s4479_s0, %s4479_s0 }
  0x22   : > { %p4858_p6 = pnand %p3921_p5, %p5469_p1 }
  0x23   : > { %p4489_p13 = por %p4488_p12, %p4487_p11 }
  0x24   : > { %p4470_p7 = pneg %p4858_p6 }
  0x26   : > { %p4482_p9 = pnand %p4480_p8, %p4470_p7 }
  0x28   : > { %p4483_p10 = pneg %p4482_p9 }
  0x2a   : > { %p4490_p0 = pnand %p4489_p13, %p4483_p10 }
  0x2c   : > { %4493 = shalt.err (!%p4490_p0)
}
  0x2d   : > { %s4707_s21 = smov 128   ;;  %s4708_s2 = smov 8  }
  0x2e   : > { %s5494_s20 = sld [smem:[#allocation28_spill]]  ;;  %s4505_s19 = scalar_lea.vmem %s4862_s28, 8192 }
  0x2f   : > { %p4506_p2 = scmp.ne.s32.totalorder %s4862_s28, %s4505_s19  ;;  %p4513_p9 = scmp.lt.s32.totalorder %s4862_s28, %s4862_s28 }
  0x30   : > { %p4514_p10 = scmp.lt.s32.totalorder %s4505_s19, %s4505_s19 }
  0x31   : > { %p4508_p5 = pnand %p4506_p2, %p4470_p7 }
  0x32   : > { %p4515_p11 = por %p4514_p10, %p4513_p9 }
  0x33   : > { %p4509_p8 = pneg %p4508_p5 }
  0x34   : > { %3924 = dma.hbm_to_vmem [thread:$0]  (!%p4858_p6), %s5494_s20, 8192, %s532_s25, [#allocation6], %s4707_s21, %s4707_s21, %s4708_s2  }
  0x35   : > { %p4516_p12 = pnand %p4515_p11, %p4509_p8 }
  0x37   : > { %4519 = shalt.err (!%p4516_p12)
}
  0x38   : > { %s4709_s0 = smov 256   ;;  %s4710_s18 = smov 16  }
  0x39   : > { %s5495_s14 = sld [smem:[#allocation33_spill]]  ;;  %s4531_s27 = scalar_lea.vmem %s566_s30, 2048 }
  0x3a   : > { %p4532_p13 = scmp.ne.s32.totalorder %s566_s30, %s4531_s27  ;;  %p4539_p5 = scmp.lt.s32.totalorder %s566_s30, %s566_s30 }
  0x3b   : > { %p4540_p8 = scmp.lt.s32.totalorder %s4531_s27, %s4531_s27 }
  0x3c   : > { %p4534_p0 = pnand %p4532_p13, %p4470_p7 }
  0x3d   : > { %p4541_p9 = por %p4540_p8, %p4539_p5 }
  0x3e   : > { %p4535_p2 = pneg %p4534_p0 }
  0x3f   : > { %3930 = dma.hbm_to_vmem [thread:$0]  (!%p4858_p6), %s5495_s14, 8192, %s4862_s28, [#allocation9], %s4709_s0, %s4709_s0, %s4710_s18  }
  0x40   : > { %p4542_p10 = pnand %p4541_p9, %p4535_p2 }
  0x42   : > { %4545 = shalt.err (!%p4542_p10)
}
  0x43   : > { %s5496_s12 = sld [smem:[#allocation32_spill]]  ;;  %s4711_s18 = smov [#allocation10]  }
  0x44   : > { %s597_s28 = sshll.u32 %s4711_s18, 4  ;;  %s598_s28 = int_to_ptr.vmem [resolvable:$true] %s597_s28 }
  0x45   : > { %s4557_s0 = scalar_lea.vmem %s598_s28, 8192  ;;  %p4565_p0 = scmp.lt.s32.totalorder %s598_s28, %s598_s28 }
  0x46   : > { %p4558_p11 = scmp.ne.s32.totalorder %s598_s28, %s4557_s0  ;;  %p4566_p2 = scmp.lt.s32.totalorder %s4557_s0, %s4557_s0 }
  0x48   : > { %p4560_p12 = pnand %p4558_p11, %p4470_p7  ;;  %p4567_p5 = por %p4566_p2, %p4565_p0 }
  0x49   : > { %3927 = dma.hbm_to_vmem [thread:$0]  (!%p4858_p6), %s5496_s12, 2048, %s566_s30, [#allocation6], %s4707_s21, %s4707_s21, %s4708_s2  }
  0x4a   : > { %p4561_p13 = pneg %p4560_p12 }
  0x4c   : > { %p4568_p8 = pnand %p4567_p5, %p4561_p13 }
  0x4e   : > { %4571 = shalt.err (!%p4568_p8)
}
  0x4f   : > { %s5497_s16 = sld [smem:[#allocation34_spill]]  ;;  %s3483_s4 = sadd.s32 4294967294, %s4702_s24  }
  0x50   : > { %s4917_s25 = sadd.s32 1, %s4702_s24   ;;  %s75_s19 = sadd.s32 1, %s4698_s23 }
  0x51   : > { %5498 = sst [smem:[#allocation21_spill]] %s4917_s25  ;;  %s72_s27 = ssub.s32 %s4702_s24, %s4917_s25 }
  0x52   : > { %p73_p7 = scmp.eq.s32.totalorder %s72_s27, 0  ;;  %p82_p9 = scmp.ne.s32.totalorder %s4698_s23, %s4694_s22 }
  0x53   : > { %p83_p10 = scmp.eq.s32.totalorder %s4702_s24, 0  ;;  %p88_p11 = scmp.ne.s32.totalorder %s4694_s22, %s4690_s1 }
  0x54   : > { %s4928_s29 = scalar_select %p73_p7, %s4698_s23, %s75_s19  }
  0x55   : > { %3933 = dma.hbm_to_vmem [thread:$0]  (!%p4858_p6), %s5497_s16, 8192, %s598_s28, [#allocation9], %s4707_s21, %s4707_s21, %s4708_s2  }
  0x56   : > { %5499 = sst [smem:[#allocation22_spill]] %s4928_s29  ;;  %p4930_p12 = por %p83_p10, %p82_p9 }
  0x57   : > { %p4936_p6 = por %p5469_p1, %p88_p11  ;;  %p448_p13 = scmp.eq.s32.totalorder %s4844_s3, 1 }
  0x58   : > { %p454_p0 = scmp.eq.s32.totalorder %s3483_s4, 1  ;;  %p3949_p2 = scmp.lt.s32.totalorder %s4702_s24, 2 }
  0x59   : > { %s5501_s21 = scalar_select %p4936_p6, 1, 0 }
  0x5a   : > { %s621_s2 = sand.u32 1, %s4698_s23   ;;  %p4943_p5 = por %p448_p13, %p82_p9 }
  0x5b   : > { %p4947_p8 = por %p454_p0, %p88_p11  ;;  %s3490_s30 = sshll.u32 %s621_s2, 4 }
  0x5c   : > { %s5502_s28 = scalar_select %p4943_p5, 1, 0 }
  0x5d   : > { %s5503_s0 = scalar_select %p4947_p8, 1, 0 }
  0x5e   : > { %s3817_s20 = sshll.u32 %s4702_s24, 8  ;;  %s5505_s12 = sld [smem:[#allocation25_spill]] }
  0x5f   : > { %5504 = sst [smem:[#allocation23_spill]] %s5503_s0  ;;  %s625_s4 = scalar_lea.vmem [#allocation2], %s3490_s30 }
  0x60   : > { %s633_s16 = sshll.u32 %s625_s4, 4  ;;  %p4959_p7 = pnand %p3949_p2, %p4930_p12  ;;  %s634_s16 = int_to_ptr.vmem [resolvable:$true] %s633_s16 }
  0x61   : > { %s622_s23 = scalar_lea.sflag [#allocation3], %s621_s2 }
  0x62   : > { %p4574_p10 = pneg %p4959_p7 }
  0x64   : > { %s4955_s14 = scalar_lea.hbm %s5505_s12, %s3817_s20  ;;  %s4577_s19 = scalar_lea.hbm %s5505_s12, 512 }
  0x65   : > { %s4572_s25 = scalar_lea.hbm %s4955_s14, 256  ;;  %p4578_p0 = scmp.lt.s32.totalorder %s4955_s14, %s5505_s12 }
  0x66   : > { %p4573_p9 = scmp.ne.s32.totalorder %s4955_s14, %s4572_s25  ;;  %p4579_p12 = scmp.lt.s32.totalorder %s4577_s19, %s4572_s25 }
  0x68   : > { %p4575_p11 = pnand %p4574_p10, %p4573_p9  ;;  %p4580_p2 = por %p4579_p12, %p4578_p0 }
  0x6a   : > { %p4576_p13 = pneg %p4575_p11 }
  0x6c   : > { %p4581_p4 = pnand %p4580_p2, %p4576_p13 }
  0x6e   : > { %4584 = shalt.err (!%p4581_p4)
}
  0x6f   : > { %s4585_s18 = scalar_lea.vmem %s634_s16, 256  ;;  %s4712_s2 = smov [#allocation2]  }
  0x70   : > { %p4586_p1 = scmp.ne.s32.totalorder %s634_s16, %s4585_s18  ;;  %s4590_s24 = sshll.u32 %s4712_s2, 4  ;;  %s4591_s24 = int_to_ptr.vmem [resolvable:$false] %s4590_s24 }
  0x71   : > { %s4592_s0 = scalar_lea.vmem %s4591_s24, 512  ;;  %p4593_p9 = scmp.lt.s32.totalorder %s634_s16, %s4591_s24 }
  0x72   : > { %p4588_p8 = pnand %p4586_p1, %p4574_p10  ;;  %p4594_p11 = scmp.lt.s32.totalorder %s4592_s0, %s4585_s18 }
  0x74   : > { %p4589_p5 = pneg %p4588_p8  ;;  %p4595_p6 = por %p4594_p11, %p4593_p9 }
  0x76   : > { %p4596_p3 = pnand %p4595_p6, %p4589_p5 }
  0x78   : > { %4599 = shalt.err (!%p4596_p3)
}
  0x79   : > { %3937 = dma.hbm_to_vmem [thread:$0]  (!%p4959_p7), %s4955_s14, 256, %s634_s16, %s622_s23  }
  0x7a   : > { %p5507_p13 = scmp.ne.s32.totalorder %s5492_s26, 0 }
  0x7b   : > { %s4980_s25 = sand.u32 (!%p5507_p13), 1, %s4694_s22   ;;  %p5508_p1 = scmp.ne.s32.totalorder (!%p5507_p13), %s5501_s21, 0 }
  0x7c   : > { %642 = sbr.rel (%p5507_p13) target bundleno = 2034 (0x7f2), region = 92  ;;  %s3494_s20 = sshll.u32 (!%p5507_p13), %s4980_s25, 4 }
  0x7d   : > { %s645_s24 = scalar_lea.sflag (!%p5507_p13), [#allocation3], %s4980_s25  ;;  %s4986_s0 = scalar_lea.vmem (!%p5507_p13), [#allocation2], %s3494_s20 }
  0x81   : > { %4669 = dma.done.wait (%p5508_p1), %s645_s24, 256  }
  0x82   : > { %4671 = vsyncadd (%p5508_p1), %s645_s24, 4294967040  ;;  %p5509_p3 = scmp.eq.s32.totalorder %s4844_s3, 0 }
  0x84   : > { %4673 = dma.done.wait (%p5509_p3), [#allocation6], 10240   ;;  %p5510_p4 = pmov %p5509_p3 }
  0x85   : > { %p5511_p6 = pmov %p5509_p3 }
  0x86   : > { %4675 = vsyncadd (%p5510_p4), [#allocation6], 4294957056 }
  0x87   : > { %4677 = dma.done.wait (%p5511_p6), [#allocation9], 16384   ;;  %p5512_p5 = pmov %p5509_p3 }
  0x88   : > { %s5513_s23 = sld [smem:[#allocation26_spill]]  ;;  %v744_v46 = vld [vmem:[%s4986_s0 + $0x8] sm:$0xff]  ;;  %vm4714_vm0 = vmmov 0   ;;  %p734_p8 = scmp.lt.s32.totalorder %s4844_s3, 1 }
  0x89   : > { %4679 = vsyncadd (%p5512_p5), [#allocation9], 4294950912  ;;  %v746_v47 = vpack.c.bf16 %v744_v46, %v744_v46  ;;  %v4154_v46 = vld [vmem:[#allocation5 + $0xd0] ss:$8 sps:$4 sm:$0xff]   ;;  %s5515_s6 = sld [smem:[#allocation30_spill]]  ;;  %s3499_s2 = sshll.u32 %s4980_s25, 3 }
  0x8a   : > { %s5516_s16 = sld [smem:[#allocation27_spill]]  ;;  %s5349_s21 = scalar_lea.vmem [#allocation11], %s3499_s2 }
  0x8b   : > { %1185 = vmatprep.mubr.bf16.mxu0 %v746_v47  ;;  %1226 = vmatprep.mubr.bf16.mxu1 %v746_v47  ;;  %v4157_v47 = vld [vmem:[#allocation5 + $0x1d0] ss:$8 sps:$4 sm:$0xff]   ;;  %s5517_s5 = sld [smem:[#allocation29_spill]]  ;;  %s5376_s27 = scalar_lea.vmem [#allocation12], %s3494_s20 }
  0x8c   : > { %s5518_s7 = sld [smem:[#allocation31_spill]]  ;;  %s3812_s20 = sshll.u32 %s4844_s3, 7 }
  0x8d   : > { %s5337_s4 = scalar_select %p734_p8, %s4844_s3, 1 }
  0x8e   : > { %s5514_s26 = smov %s5513_s23  ;;  %v3998_v0 = vld [vmem:[%s5513_s23 + $0xe4] ss:$16 sps:$4 sm:$0xff]   ;;  %s3290_s19 = sshll.u32 %s5349_s21, 4  ;;  %s3291_s19 = int_to_ptr.vmem [resolvable:$true] %s3290_s19 }
  0x8f   : > { %v4000_v1 = vld [vmem:[%s5514_s26 + $0xec] ss:$16 sps:$4 sm:$0xff]   ;;  %1153 = vmatprep.subr.bf16.mxu0 %v3998_v0  ;;  %v4002_v2 = vld [vmem:[%s5514_s26 + $0xe0] ss:$16 sps:$4 sm:$0xff]   ;;  %v4003_v3 = vld [vmem:[%s5514_s26 + $0xe8] ss:$16 sps:$4 sm:$0xff]  }
  0x90   : > { %1194 = vmatprep.subr.bf16.mxu1 %v4000_v1  ;;  %v4004_v4 = vld [vmem:[%s5514_s26 + $0xc4] ss:$16 sps:$4 sm:$0xff]   ;;  %1154 = vmatpush1.bf16.msra.mxu0 %v4002_v2  ;;  %v4006_v5 = vld [vmem:[%s5514_s26 + $0xcc] ss:$16 sps:$4 sm:$0xff]   ;;  %v4008_v6 = vld [vmem:[%s5514_s26 + $0xc0] ss:$16 sps:$4 sm:$0xff]  }
  0x91   : > { %1195 = vmatpush1.bf16.msra.mxu1 %v4003_v3  ;;  %1155 = vmatprep.subr.bf16.mxu0 %v4004_v4  ;;  %v4009_v7 = vld [vmem:[%s5514_s26 + $0xc8] ss:$16 sps:$4 sm:$0xff]   ;;  %v4010_v8 = vld [vmem:[%s5514_s26 + $0xa4] ss:$16 sps:$4 sm:$0xff]   ;;  %v4012_v9 = vld [vmem:[%s5514_s26 + $0xac] ss:$16 sps:$4 sm:$0xff]  }
  0x92   : > { %1196 = vmatprep.subr.bf16.mxu1 %v4006_v5  ;;  %v4014_v10 = vld [vmem:[%s5514_s26 + $0xa0] ss:$16 sps:$4 sm:$0xff]   ;;  %v4015_v11 = vld [vmem:[%s5514_s26 + $0xa8] ss:$16 sps:$4 sm:$0xff]   ;;  %v4016_v12 = vld [vmem:[%s5514_s26 + $0x84] ss:$16 sps:$4 sm:$0xff]  }
  0x93   : > { %v4018_v13 = vld [vmem:[%s5514_s26 + $0x8c] ss:$16 sps:$4 sm:$0xff]   ;;  %v4020_v14 = vld [vmem:[%s5514_s26 + $0x80] ss:$16 sps:$4 sm:$0xff]   ;;  %v4021_v15 = vld [vmem:[%s5514_s26 + $0x88] ss:$16 sps:$4 sm:$0xff]  }
  0x94   : > { %1156 = vmatpush1.bf16.msra.mxu0 %v4008_v6  ;;  %v4022_v16 = vld [vmem:[%s5514_s26 + $0x64] ss:$16 sps:$4 sm:$0xff]   ;;  %v4024_v17 = vld [vmem:[%s5514_s26 + $0x6c] ss:$16 sps:$4 sm:$0xff]   ;;  %v4026_v18 = vld [vmem:[%s5514_s26 + $0x60] ss:$16 sps:$4 sm:$0xff]  }
  0x95   : > { %1197 = vmatpush1.bf16.msra.mxu1 %v4009_v7  ;;  %1157 = vmatprep.subr.bf16.mxu0 %v4010_v8  ;;  %v4027_v19 = vld [vmem:[%s5514_s26 + $0x68] ss:$16 sps:$4 sm:$0xff]   ;;  %v4028_v20 = vld [vmem:[%s5514_s26 + $0x44] ss:$16 sps:$4 sm:$0xff]   ;;  %v4030_v21 = vld [vmem:[%s5514_s26 + $0x4c] ss:$16 sps:$4 sm:$0xff]  }
  0x96   : > { %1198 = vmatprep.subr.bf16.mxu1 %v4012_v9  ;;  %v4032_v22 = vld [vmem:[%s5514_s26 + $0x40] ss:$16 sps:$4 sm:$0xff]   ;;  %v4033_v23 = vld [vmem:[%s5514_s26 + $0x48] ss:$16 sps:$4 sm:$0xff]   ;;  %v4034_v24 = vld [vmem:[%s5514_s26 + $0x24] ss:$16 sps:$4 sm:$0xff]  }
  0x97   : > { %v4036_v25 = vld [vmem:[%s5514_s26 + $0x2c] ss:$16 sps:$4 sm:$0xff]   ;;  %v4038_v26 = vld [vmem:[%s5514_s26 + $0x20] ss:$16 sps:$4 sm:$0xff]   ;;  %v4039_v27 = vld [vmem:[%s5514_s26 + $0x28] ss:$16 sps:$4 sm:$0xff]  }
  0x98   : > { %1158 = vmatpush1.bf16.msra.mxu0 %v4014_v10  ;;  %v4040_v28 = vld [vmem:[%s5514_s26 + $0x4] ss:$16 sps:$4 sm:$0xff]   ;;  %v4042_v29 = vld [vmem:[%s5514_s26 + $0xc] ss:$16 sps:$4 sm:$0xff]   ;;  %v4044_v30 = vld [vmem:[%s5514_s26] ss:$16 sps:$4 sm:$0xff]  }
  0x99   : > { %1199 = vmatpush1.bf16.msra.mxu1 %v4015_v11  ;;  %1159 = vmatprep.subr.bf16.mxu0 %v4016_v12  ;;  %v4045_v31 = vld [vmem:[%s5514_s26 + $0x8] ss:$16 sps:$4 sm:$0xff]   ;;  %v4046_v32 = vld [vmem:[%s5514_s26 + $0x1e4] ss:$16 sps:$4 sm:$0xff]   ;;  %v4048_v33 = vld [vmem:[%s5514_s26 + $0x1ec] ss:$16 sps:$4 sm:$0xff]  }
  0x9a   : > { %1200 = vmatprep.subr.bf16.mxu1 %v4018_v13  ;;  %v4050_v34 = vld [vmem:[%s5514_s26 + $0x1e0] ss:$16 sps:$4 sm:$0xff]   ;;  %v4051_v35 = vld [vmem:[%s5514_s26 + $0x1e8] ss:$16 sps:$4 sm:$0xff]   ;;  %v4052_v36 = vld [vmem:[%s5514_s26 + $0x1c4] ss:$16 sps:$4 sm:$0xff]  }
  0x9b   : > { %v4054_v37 = vld [vmem:[%s5514_s26 + $0x1cc] ss:$16 sps:$4 sm:$0xff]   ;;  %v4056_v38 = vld [vmem:[%s5514_s26 + $0x1c0] ss:$16 sps:$4 sm:$0xff]   ;;  %v4057_v39 = vld [vmem:[%s5514_s26 + $0x1c8] ss:$16 sps:$4 sm:$0xff]  }
  0x9c   : > { %1160 = vmatpush1.bf16.msra.mxu0 %v4020_v14  ;;  %v4058_v40 = vld [vmem:[%s5514_s26 + $0x1a4] ss:$16 sps:$4 sm:$0xff]   ;;  %v4060_v41 = vld [vmem:[%s5514_s26 + $0x1ac] ss:$16 sps:$4 sm:$0xff]   ;;  %v4062_v42 = vld [vmem:[%s5514_s26 + $0x1a0] ss:$16 sps:$4 sm:$0xff]  }
  0x9d   : > { %1201 = vmatpush1.bf16.msra.mxu1 %v4021_v15  ;;  %1161 = vmatprep.subr.bf16.mxu0 %v4022_v16  ;;  %v4063_v43 = vld [vmem:[%s5514_s26 + $0x1a8] ss:$16 sps:$4 sm:$0xff]   ;;  %v4064_v44 = vld [vmem:[%s5514_s26 + $0x184] ss:$16 sps:$4 sm:$0xff]   ;;  %v4066_v45 = vld [vmem:[%s5514_s26 + $0x18c] ss:$16 sps:$4 sm:$0xff]  }
  0x9e   : > { %1202 = vmatprep.subr.bf16.mxu1 %v4024_v17  ;;  %v4068_v48 = vld [vmem:[%s5514_s26 + $0x180] ss:$16 sps:$4 sm:$0xff]   ;;  %v4069_v49 = vld [vmem:[%s5514_s26 + $0x188] ss:$16 sps:$4 sm:$0xff]   ;;  %v4070_v50 = vld [vmem:[%s5514_s26 + $0x164] ss:$16 sps:$4 sm:$0xff]  }
  0x9f   : > { %v4072_v51 = vld [vmem:[%s5514_s26 + $0x16c] ss:$16 sps:$4 sm:$0xff]   ;;  %v4074_v52 = vld [vmem:[%s5514_s26 + $0x160] ss:$16 sps:$4 sm:$0xff]   ;;  %v4075_v53 = vld [vmem:[%s5514_s26 + $0x168] ss:$16 sps:$4 sm:$0xff]  }
  0xa0   : > { %1162 = vmatpush1.bf16.msra.mxu0 %v4026_v18  ;;  %v4076_v54 = vld [vmem:[%s5514_s26 + $0x144] ss:$16 sps:$4 sm:$0xff]   ;;  %v4078_v55 = vld [vmem:[%s5514_s26 + $0x14c] ss:$16 sps:$4 sm:$0xff]   ;;  %v4080_v56 = vld [vmem:[%s5514_s26 + $0x140] ss:$16 sps:$4 sm:$0xff]  }
  0xa1   : > { %1203 = vmatpush1.bf16.msra.mxu1 %v4027_v19  ;;  %1163 = vmatprep.subr.bf16.mxu0 %v4028_v20  ;;  %v4081_v57 = vld [vmem:[%s5514_s26 + $0x148] ss:$16 sps:$4 sm:$0xff]   ;;  %v4082_v58 = vld [vmem:[%s5514_s26 + $0x124] ss:$16 sps:$4 sm:$0xff]   ;;  %v4084_v59 = vld [vmem:[%s5514_s26 + $0x12c] ss:$16 sps:$4 sm:$0xff]  }
  0xa2   : > { %1204 = vmatprep.subr.bf16.mxu1 %v4030_v21  ;;  %v4086_v60 = vld [vmem:[%s5514_s26 + $0x120] ss:$16 sps:$4 sm:$0xff]   ;;  %v4087_v61 = vld [vmem:[%s5514_s26 + $0x128] ss:$16 sps:$4 sm:$0xff]   ;;  %v4088_v62 = vld [vmem:[%s5514_s26 + $0x104] ss:$16 sps:$4 sm:$0xff]  }
  0xa3   : > { %v4090_v63 = vld [vmem:[%s5514_s26 + $0x10c] ss:$16 sps:$4 sm:$0xff]   ;;  %v4092_v0 = vld [vmem:[%s5514_s26 + $0x100] ss:$16 sps:$4 sm:$0xff]   ;;  %v4093_v1 = vld [vmem:[%s5514_s26 + $0x108] ss:$16 sps:$4 sm:$0xff]  }
  0xa4   : > { %1164 = vmatpush1.bf16.msra.mxu0 %v4032_v22  ;;  %v743_v2 = vld [vmem:[%s4986_s0] sm:$0xff]  ;;  %s5475_s18 = sshll.u32 %s5337_s4, 3  ;;  %s5520_s24 = sld [smem:[#allocation35_spill]] }
  0xa5   : > { %1205 = vmatpush1.bf16.msra.mxu1 %v4033_v23  ;;  %1165 = vmatprep.subr.bf16.mxu0 %v4034_v24  ;;  %v4096_v3 = vld [vmem:[#allocation5 + $0x74] ss:$8 sps:$4 sm:$0xff]   ;;  %v745_v5 = vpack.c.bf16 %v743_v2, %v743_v2  ;;  %v4094_v6 = vld [vmem:[#allocation5 + $0x70] ss:$8 sps:$4 sm:$0xff]   ;;  %v4102_v8 = vld [vmem:[#allocation5 + $0x64] ss:$8 sps:$4 sm:$0xff]  }
  0xa6   : > { %1206 = vmatprep.subr.bf16.mxu1 %v4036_v25  ;;  %v4099_v4 = vld [vmem:[#allocation5 + $0x174] ss:$8 sps:$4 sm:$0xff]   ;;  %v4097_v7 = vld [vmem:[#allocation5 + $0x170] ss:$8 sps:$4 sm:$0xff]   ;;  %v4105_v9 = vld [vmem:[#allocation5 + $0x164] ss:$8 sps:$4 sm:$0xff]  }
  0xa7   : > { %v4100_v10 = vld [vmem:[#allocation5 + $0x60] ss:$8 sps:$4 sm:$0xff]   ;;  %v4108_v12 = vld [vmem:[#allocation5 + $0x54] ss:$8 sps:$4 sm:$0xff]   ;;  %v4106_v14 = vld [vmem:[#allocation5 + $0x50] ss:$8 sps:$4 sm:$0xff]  }
  0xa8   : > { %1166 = vmatpush1.bf16.msra.mxu0 %v4038_v26  ;;  %v4103_v11 = vld [vmem:[#allocation5 + $0x160] ss:$8 sps:$4 sm:$0xff]   ;;  %v4111_v13 = vld [vmem:[#allocation5 + $0x154] ss:$8 sps:$4 sm:$0xff]   ;;  %v4109_v15 = vld [vmem:[#allocation5 + $0x150] ss:$8 sps:$4 sm:$0xff]  }
  0xa9   : > { %1207 = vmatpush1.bf16.msra.mxu1 %v4039_v27  ;;  %1167 = vmatprep.subr.bf16.mxu0 %v4040_v28  ;;  %v4114_v16 = vld [vmem:[#allocation5 + $0x44] ss:$8 sps:$4 sm:$0xff]   ;;  %v4112_v18 = vld [vmem:[#allocation5 + $0x40] ss:$8 sps:$4 sm:$0xff]   ;;  %v4120_v20 = vld [vmem:[#allocation5 + $0x34] ss:$8 sps:$4 sm:$0xff]  }
  0xaa   : > { %1208 = vmatprep.subr.bf16.mxu1 %v4042_v29  ;;  %v4117_v17 = vld [vmem:[#allocation5 + $0x144] ss:$8 sps:$4 sm:$0xff]   ;;  %v4115_v19 = vld [vmem:[#allocation5 + $0x140] ss:$8 sps:$4 sm:$0xff]   ;;  %v4123_v21 = vld [vmem:[#allocation5 + $0x134] ss:$8 sps:$4 sm:$0xff]   ;;  %s5521_s14 = smov %s5520_s24 }
  0xab   : > { %v4118_v22 = vld [vmem:[#allocation5 + $0x30] ss:$8 sps:$4 sm:$0xff]   ;;  %v4126_v24 = vld [vmem:[#allocation5 + $0x24] ss:$8 sps:$4 sm:$0xff]   ;;  %v4124_v26 = vld [vmem:[#allocation5 + $0x20] ss:$8 sps:$4 sm:$0xff]  }
  0xac   : > { %1168 = vmatpush1.bf16.msra.mxu0 %v4044_v30  ;;  %v4121_v23 = vld [vmem:[#allocation5 + $0x130] ss:$8 sps:$4 sm:$0xff]   ;;  %v4129_v25 = vld [vmem:[#allocation5 + $0x124] ss:$8 sps:$4 sm:$0xff]   ;;  %v4127_v27 = vld [vmem:[#allocation5 + $0x120] ss:$8 sps:$4 sm:$0xff]  }
  0xad   : > { %1209 = vmatpush1.bf16.msra.mxu1 %v4045_v31  ;;  %1169 = vmatprep.subr.bf16.mxu0 %v4046_v32  ;;  %v4132_v28 = vld [vmem:[#allocation5 + $0x14] ss:$8 sps:$4 sm:$0xff]   ;;  %v4130_v30 = vld [vmem:[#allocation5 + $0x10] ss:$8 sps:$4 sm:$0xff]   ;;  %v4138_v32 = vld [vmem:[#allocation5 + $0x4] ss:$8 sps:$4 sm:$0xff]  }
  0xae   : > { %1210 = vmatprep.subr.bf16.mxu1 %v4048_v33  ;;  %v4135_v29 = vld [vmem:[#allocation5 + $0x114] ss:$8 sps:$4 sm:$0xff]   ;;  %v4133_v31 = vld [vmem:[#allocation5 + $0x110] ss:$8 sps:$4 sm:$0xff]   ;;  %v4141_v33 = vld [vmem:[#allocation5 + $0x104] ss:$8 sps:$4 sm:$0xff]  }
  0xaf   : > { %v4184_v2 = vld [vmem:[#allocation5 + $0x80] ss:$8 sps:$4 sm:$0xff]   ;;  %s4600_s29 = scalar_lea.vmem %s3291_s19, 128  ;;  %p5522_p10 = scmp.ne.s32.totalorder %s5502_s28, 0 }
  0xb0   : > { %1170 = vmatpush2.bf16.msra.mxu0 %v4050_v34  ;;  %v4136_v34 = vld [vmem:[#allocation5] ss:$8 sps:$4 sm:$0xff]   ;;  %p4601_p7 = scmp.ne.s32.totalorder %s3291_s19, %s4600_s29 }
  0xb1   : > { %1211 = vmatpush2.bf16.msra.mxu1 %v4051_v35  ;;  %1171 = vmatprep.subr.bf16.mxu0 %v4052_v36  ;;  %v4139_v35 = vld [vmem:[#allocation5 + $0x100] ss:$8 sps:$4 sm:$0xff]   ;;  %v4144_v36 = vld [vmem:[#allocation5 + $0xf4] ss:$8 sps:$4 sm:$0xff]  }
  0xb2   : > { %1212 = vmatprep.subr.bf16.mxu1 %v4054_v37  ;;  %v4147_v37 = vld [vmem:[#allocation5 + $0x1f4] ss:$8 sps:$4 sm:$0xff]   ;;  %p4602_p0 = pnand %p4601_p7, %p5522_p10 }
  0xb4   : > { %1172 = vmatpush2.bf16.msra.mxu0 %v4056_v38  ;;  %v4142_v38 = vld [vmem:[#allocation5 + $0xf0] ss:$8 sps:$4 sm:$0xff]   ;;  %p4603_p12 = pneg %p4602_p0 }
  0xb5   : > { %1213 = vmatpush2.bf16.msra.mxu1 %v4057_v39  ;;  %1173 = vmatprep.subr.bf16.mxu0 %v4058_v40  ;;  %v4145_v39 = vld [vmem:[#allocation5 + $0x1f0] ss:$8 sps:$4 sm:$0xff]   ;;  %v4150_v40 = vld [vmem:[#allocation5 + $0xe4] ss:$8 sps:$4 sm:$0xff]  }
  0xb6   : > { %1214 = vmatprep.subr.bf16.mxu1 %v4060_v41  ;;  %v4153_v41 = vld [vmem:[#allocation5 + $0x1e4] ss:$8 sps:$4 sm:$0xff]  }
  0xb8   : > { %1174 = vmatpush2.bf16.msra.mxu0 %v4062_v42  ;;  %v4148_v42 = vld [vmem:[#allocation5 + $0xe0] ss:$8 sps:$4 sm:$0xff]  }
  0xb9   : > { %1215 = vmatpush2.bf16.msra.mxu1 %v4063_v43  ;;  %1175 = vmatprep.subr.bf16.mxu0 %v4064_v44  ;;  %v4151_v43 = vld [vmem:[#allocation5 + $0x1e0] ss:$8 sps:$4 sm:$0xff]   ;;  %v4156_v44 = vld [vmem:[#allocation5 + $0xd4] ss:$8 sps:$4 sm:$0xff]  }
  0xba   : > { %1216 = vmatprep.subr.bf16.mxu1 %v4066_v45  ;;  %v4159_v45 = vld [vmem:[#allocation5 + $0x1d4] ss:$8 sps:$4 sm:$0xff]  }
  0xbc   : > { %1176 = vmatpush2.bf16.msra.mxu0 %v4068_v48  ;;  %v4162_v48 = vld [vmem:[#allocation5 + $0xc4] ss:$8 sps:$4 sm:$0xff]  }
  0xbd   : > { %1217 = vmatpush2.bf16.msra.mxu1 %v4069_v49  ;;  %1177 = vmatprep.subr.bf16.mxu0 %v4070_v50  ;;  %v4165_v49 = vld [vmem:[#allocation5 + $0x1c4] ss:$8 sps:$4 sm:$0xff]   ;;  %v4160_v50 = vld [vmem:[#allocation5 + $0xc0] ss:$8 sps:$4 sm:$0xff]  }
  0xbe   : > { %1218 = vmatprep.subr.bf16.mxu1 %v4072_v51  ;;  %v4163_v51 = vld [vmem:[#allocation5 + $0x1c0] ss:$8 sps:$4 sm:$0xff]  }
  0xc0   : > { %1178 = vmatpush2.bf16.msra.mxu0 %v4074_v52  ;;  %v4168_v52 = vld [vmem:[#allocation5 + $0xb4] ss:$8 sps:$4 sm:$0xff]  }
  0xc1   : > { %1219 = vmatpush2.bf16.msra.mxu1 %v4075_v53  ;;  %1179 = vmatprep.subr.bf16.mxu0 %v4076_v54  ;;  %v4171_v53 = vld [vmem:[#allocation5 + $0x1b4] ss:$8 sps:$4 sm:$0xff]   ;;  %v4166_v54 = vld [vmem:[#allocation5 + $0xb0] ss:$8 sps:$4 sm:$0xff]  }
  0xc2   : > { %1220 = vmatprep.subr.bf16.mxu1 %v4078_v55  ;;  %v4169_v55 = vld [vmem:[#allocation5 + $0x1b0] ss:$8 sps:$4 sm:$0xff]  }
  0xc4   : > { %1180 = vmatpush2.bf16.msra.mxu0 %v4080_v56  ;;  %v4174_v56 = vld [vmem:[#allocation5 + $0xa4] ss:$8 sps:$4 sm:$0xff]  }
  0xc5   : > { %1221 = vmatpush2.bf16.msra.mxu1 %v4081_v57  ;;  %1181 = vmatprep.subr.bf16.mxu0 %v4082_v58  ;;  %v4177_v57 = vld [vmem:[#allocation5 + $0x1a4] ss:$8 sps:$4 sm:$0xff]   ;;  %v4172_v58 = vld [vmem:[#allocation5 + $0xa0] ss:$8 sps:$4 sm:$0xff]  }
  0xc6   : > { %1222 = vmatprep.subr.bf16.mxu1 %v4084_v59  ;;  %v4175_v59 = vld [vmem:[#allocation5 + $0x1a0] ss:$8 sps:$4 sm:$0xff]  }
  0xc8   : > { %1182 = vmatpush2.bf16.msra.mxu0 %v4086_v60  ;;  %v4180_v60 = vld [vmem:[#allocation5 + $0x94] ss:$8 sps:$4 sm:$0xff]  }
  0xc9   : > { %1223 = vmatpush2.bf16.msra.mxu1 %v4087_v61  ;;  %1183 = vmatprep.subr.bf16.mxu0 %v4088_v62  ;;  %v4183_v61 = vld [vmem:[#allocation5 + $0x194] ss:$8 sps:$4 sm:$0xff]   ;;  %v4178_v62 = vld [vmem:[#allocation5 + $0x90] ss:$8 sps:$4 sm:$0xff]  }
  0xca   : > { %1224 = vmatprep.subr.bf16.mxu1 %v4090_v63  ;;  %v4181_v63 = vld [vmem:[#allocation5 + $0x190] ss:$8 sps:$4 sm:$0xff]  }
  0xcc   : > { %1184 = vmatpush2.bf16.msra.mxu0 %v4092_v0  ;;  %v4186_v0 = vld [vmem:[#allocation5 + $0x84] ss:$8 sps:$4 sm:$0xff]  }
  0xcd   : > { %1225 = vmatpush2.bf16.msra.mxu1 %v4093_v1  ;;  %1639 = vmatprep.subr.bf16.mxu0 %v4096_v3  ;;  %v4189_v1 = vld [vmem:[#allocation5 + $0x184] ss:$8 sps:$4 sm:$0xff]   ;;  %v4187_v3 = vld [vmem:[#allocation5 + $0x180] ss:$8 sps:$4 sm:$0xff]  }
  0xce   : > { %1680 = vmatprep.subr.bf16.mxu1 %v4099_v4  ;;  %v4190_v4 = vld [vmem:[%s5515_s6 + $0x78] sm:$0xff]  }
  0xcf   : > { %1186 = vmatmul.mubr.bf16.vlgmr.msra.gmra.mxu0 %v745_v5 }
  0xd0   : > { %1227 = vmatmul.mubr.bf16.vlgmr.msra.gmra.mxu1 %v745_v5  ;;  %1640 = vmatpush1.bf16.msra.mxu0 %v4094_v6  ;;  %v813_v5 = vlaneseq }
  0xd1   : > { %1681 = vmatpush1.bf16.msra.mxu1 %v4097_v7  ;;  %1641 = vmatprep.subr.bf16.mxu0 %v4102_v8 }
  0xd2   : > { %1682 = vmatprep.subr.bf16.mxu1 %v4105_v9  ;;  %v5197_v6 = vshrl.u32 %v813_v5, 7  ;;  %v811_v9 = vld [vmem:[%s5516_s16] sm:$0xf]  ;;  %s5519_s16 = sld [smem:[#allocation24_spill]] }
  0xd4   : > { %1642 = vmatpush1.bf16.msra.mxu0 %v4100_v10  ;;  %v5200_v7 = vsub.s32 0, %v5197_v6  ;;  %v823_v8 = vsub.s32 2, %v5197_v6  ;;  %v5207_v10 = vsub.s32 1, %v5197_v6 }
  0xd5   : > { %1683 = vmatpush1.bf16.msra.mxu1 %v4103_v11  ;;  %1643 = vmatprep.subr.bf16.mxu0 %v4108_v12  ;;  %v827_v11 = vsub.s32 3, %v5197_v6 }
  0xd6   : > { %1684 = vmatprep.subr.bf16.mxu1 %v4111_v13  ;;  %v816_v12 = vrot.slane %v811_v9, %v5200_v7  ;;  %v824_v13 = vrot.slane %v811_v9, %v823_v8 }
  0xd8   : > { %1644 = vmatpush1.bf16.msra.mxu0 %v4106_v14  ;;  %v820_v14 = vrot.slane %v811_v9, %v5207_v10  ;;  %s737_s23 = scalar_lea.vmem %s5519_s16, %s5475_s18  ;;  %s3288_s16 = scalar_lea.hbm %s5520_s24, %s3812_s20 }
  0xd9   : > { %1685 = vmatpush1.bf16.msra.mxu1 %v4109_v15  ;;  %1645 = vmatprep.subr.bf16.mxu0 %v4114_v16  ;;  %v828_v15 = vrot.slane %v811_v9, %v827_v11  ;;  %s4716_s18 = smov [#allocation11]  }
  0xda   : > { %1686 = vmatprep.subr.bf16.mxu1 %v4117_v17 }
  0xdc   : > { %1646 = vmatpush1.bf16.msra.mxu0 %v4112_v18 }
  0xdd   : > { %1687 = vmatpush1.bf16.msra.mxu1 %v4115_v19  ;;  %1647 = vmatprep.subr.bf16.mxu0 %v4120_v20 }
  0xde   : > { %1688 = vmatprep.subr.bf16.mxu1 %v4123_v21 }
  0xe0   : > { %1648 = vmatpush1.bf16.msra.mxu0 %v4118_v22 }
  0xe1   : > { %1689 = vmatpush1.bf16.msra.mxu1 %v4121_v23  ;;  %1649 = vmatprep.subr.bf16.mxu0 %v4126_v24 }
  0xe2   : > { %1690 = vmatprep.subr.bf16.mxu1 %v4129_v25 }
  0xe4   : > { %1650 = vmatpush1.bf16.msra.mxu0 %v4124_v26 }
  0xe5   : > { %1691 = vmatpush1.bf16.msra.mxu1 %v4127_v27  ;;  %1651 = vmatprep.subr.bf16.mxu0 %v4132_v28 }
  0xe6   : > { %1692 = vmatprep.subr.bf16.mxu1 %v4135_v29 }
  0xe8   : > { %1652 = vmatpush1.bf16.msra.mxu0 %v4130_v30 }
  0xe9   : > { %1693 = vmatpush1.bf16.msra.mxu1 %v4133_v31  ;;  %1653 = vmatprep.subr.bf16.mxu0 %v4138_v32 }
  0xea   : > { %1694 = vmatprep.subr.bf16.mxu1 %v4141_v33 }
  0xec   : > { %1654 = vmatpush1.bf16.msra.mxu0 %v4136_v34  ;;  %v4191_v34 = vld [vmem:[%s5515_s6 + $0x38] sm:$0xff]  }
  0xed   : > { %1695 = vmatpush1.bf16.msra.mxu1 %v4139_v35  ;;  %1655 = vmatprep.subr.bf16.mxu0 %v4144_v36 }
  0xee   : > { %1696 = vmatprep.subr.bf16.mxu1 %v4147_v37  ;;  %v4192_v37 = vld [vmem:[%s5515_s6 + $0x70] sm:$0xff]  }
  0xf0   : > { %1656 = vmatpush2.bf16.msra.mxu0 %v4142_v38  ;;  %v4193_v38 = vld [vmem:[%s5515_s6 + $0x30] sm:$0xff]  }
  0xf1   : > { %1697 = vmatpush2.bf16.msra.mxu1 %v4145_v39  ;;  %1657 = vmatprep.subr.bf16.mxu0 %v4150_v40  ;;  %v4194_v39 = vld [vmem:[%s5515_s6 + $0x68] sm:$0xff]  }
  0xf2   : > { %1698 = vmatprep.subr.bf16.mxu1 %v4153_v41  ;;  %v4195_v40 = vld [vmem:[%s5515_s6 + $0x28] sm:$0xff]   ;;  %v4196_v41 = vld [vmem:[%s5515_s6 + $0x60] sm:$0xff]  }
  0xf4   : > { %1658 = vmatpush2.bf16.msra.mxu0 %v4148_v42  ;;  %v4197_v42 = vld [vmem:[%s5515_s6 + $0x20] sm:$0xff]  }
  0xf5   : > { %1699 = vmatpush2.bf16.msra.mxu1 %v4151_v43  ;;  %1659 = vmatprep.subr.bf16.mxu0 %v4156_v44  ;;  %v4198_v43 = vld [vmem:[%s5515_s6 + $0x58] sm:$0xff]  }
  0xf6   : > { %1700 = vmatprep.subr.bf16.mxu1 %v4159_v45  ;;  %v4199_v44 = vld [vmem:[%s5515_s6 + $0x18] sm:$0xff]   ;;  %v4200_v45 = vld [vmem:[%s5515_s6 + $0x50] sm:$0xff]  }
  0xf8   : > { %1660 = vmatpush2.bf16.msra.mxu0 %v4154_v46  ;;  %v4201_v46 = vld [vmem:[%s5515_s6 + $0x10] sm:$0xff]  }
  0xf9   : > { %1701 = vmatpush2.bf16.msra.mxu1 %v4157_v47  ;;  %1661 = vmatprep.subr.bf16.mxu0 %v4162_v48  ;;  %v4202_v47 = vld [vmem:[%s5515_s6 + $0x48] sm:$0xff]  }
  0xfa   : > { %1702 = vmatprep.subr.bf16.mxu1 %v4165_v49  ;;  %v4203_v48 = vld [vmem:[%s5515_s6 + $0x8] sm:$0xff]   ;;  %v4204_v49 = vld [vmem:[%s5515_s6 + $0x40] sm:$0xff]  }
  0xfc   : > { %1662 = vmatpush2.bf16.msra.mxu0 %v4160_v50  ;;  %v4205_v50 = vld [vmem:[%s5515_s6] sm:$0xff]  }
  0xfd   : > { %1703 = vmatpush2.bf16.msra.mxu1 %v4163_v51  ;;  %1663 = vmatprep.subr.bf16.mxu0 %v4168_v52  ;;  %v4206_v51 = vld [vmem:[%s5449_s8 + $0x38] sm:$0xff]   ;;  %v4713_v52 = vmov 0.0  }
  0xfe   : > { %1704 = vmatprep.subr.bf16.mxu1 %v4171_v53  ;;  %v4207_v53 = vld [vmem:[%s5449_s8 + $0x30] sm:$0xff]  }
 0x100   : > { %1664 = vmatpush2.bf16.msra.mxu0 %v4166_v54  ;;  %v1307_v54 = vld [vmem:[%s5517_s5] sm:$0x3] }
 0x101   : > { %1705 = vmatpush2.bf16.msra.mxu1 %v4169_v55  ;;  %1665 = vmatprep.subr.bf16.mxu0 %v4174_v56  ;;  %v1312_v55 = vrot.slane %v1307_v54, %v5200_v7  ;;  %v1316_v56 = vrot.slane %v1307_v54, %v5207_v10  ;;  %v4236_v54 = vld [vmem:[#allocation7 + $0x34] ss:$8 sps:$4 sm:$0xff]  }
 0x102   : > { %1706 = vmatprep.subr.bf16.mxu1 %v4177_v57 }
 0x104   : > { %1666 = vmatpush2.bf16.msra.mxu0 %v4172_v58 }
 0x105   : > { %1707 = vmatpush2.bf16.msra.mxu1 %v4175_v59  ;;  %1667 = vmatprep.subr.bf16.mxu0 %v4180_v60 }
 0x106   : > { %1708 = vmatprep.subr.bf16.mxu1 %v4183_v61 }
 0x108   : > { %1668 = vmatpush2.bf16.msra.mxu0 %v4178_v62 }
 0x109   : > { %1709 = vmatpush2.bf16.msra.mxu1 %v4181_v63  ;;  %1669 = vmatprep.subr.bf16.mxu0 %v4186_v0 }
 0x10a   : > { %1710 = vmatprep.subr.bf16.mxu1 %v4189_v1 }
 0x10c   : > { %1670 = vmatpush2.bf16.msra.mxu0 %v4184_v2 }
 0x10d   : > { %1711 = vmatpush2.bf16.msra.mxu1 %v4187_v3  ;;  %3819 = vmatprep.subr.bf16.mxu0 %v4190_v4 }
 0x10e   : > { %3859 = vmatprep.subr.bf16.mxu1 %v4713_v52 }
 0x18f   : > { %v1187_v16 = vpop.f32.mrf.mxu0 }
 0x190   : > { %v1228_v17 = vpop.f32.mrf.mxu1  ;;  %v1188_v18 = vadd.f32 %v1187_v16, %v816_v12  ;;  %v4210_v16 = vld [vmem:[%s5449_s8 + $0x18] sm:$0xff]  }
 0x191   : > { %v1229_v19 = vadd.f32 %v1228_v17, %v824_v13  ;;  %v1189_v20 = vpop.f32.mrf.mxu0  ;;  %v4211_v17 = vld [vmem:[%s5449_s8 + $0x10] sm:$0xff]  }
 0x192   : > { %v1230_v21 = vpop.f32.mrf.mxu1  ;;  %4438 = vtanh.f32 %v1188_v18  ;;  %v1190_v22 = vadd.f32 %v1189_v20, %v820_v14  ;;  %v4208_v14 = vld [vmem:[%s5449_s8 + $0x28] sm:$0xff]   ;;  %v4214_v20 = vld [vmem:[%s5451_s10 + $0x38] sm:$0xff]  }
 0x193   : > { %v1231_v23 = vadd.f32 %v1230_v21, %v828_v15  ;;  %4440 = vtanh.f32 %v1229_v19  ;;  %v1191_v24 = vpop.f32.mrf.mxu0  ;;  %v4209_v15 = vld [vmem:[%s5449_s8 + $0x20] sm:$0xff]   ;;  %v4212_v18 = vld [vmem:[%s5449_s8 + $0x8] sm:$0xff]   ;;  %v4215_v21 = vld [vmem:[%s5451_s10 + $0x30] sm:$0xff]  }
 0x194   : > { %v1232_v25 = vpop.f32.mrf.mxu1  ;;  %4442 = vtanh.f32 %v1190_v22  ;;  %v4213_v19 = vld [vmem:[%s5449_s8] sm:$0xff]   ;;  %v4216_v22 = vld [vmem:[%s5451_s10 + $0x28] sm:$0xff]   ;;  %v4218_v24 = vld [vmem:[%s5451_s10 + $0x18] sm:$0xff]  }
 0x195   : > { %4444 = vtanh.f32 %v1231_v23  ;;  %v1192_v26 = vpop.f32.mrf.mxu0  ;;  %v4217_v23 = vld [vmem:[%s5451_s10 + $0x20] sm:$0xff]   ;;  %v4219_v25 = vld [vmem:[%s5451_s10 + $0x10] sm:$0xff]  }
 0x196   : > { %v1233_v27 = vpop.f32.mrf.mxu1 }
 0x197   : > { %v3631_v27 = vld [vmem:[%s5518_s7] ss:$0 sm:$0xff] }
 0x19f   : > { %v4439_v28 = vpop.eup %4438 }
 0x1a0   : > { %v4441_v29 = vpop.eup %4440  ;;  %v1239_v35 = vpack.c.bf16 %v4439_v28, %v4439_v28 }
 0x1a1   : > { %v4443_v30 = vpop.eup %4442  ;;  %v1241_v32 = vpack.c.bf16 %v4441_v29, %v4441_v29 }
 0x1a2   : > { %v4445_v31 = vpop.eup %4444  ;;  %v1240_v33 = vpack.c.bf16 %v4443_v30, %v4443_v30 }
 0x1a3   : > { %v1242_v36 = vpack.c.bf16 %v4445_v31, %v4445_v31 }
 0x1a4   : > { %1671 = vmatprep.mubr.bf16.mxu0 %v1240_v33 }
 0x1a5   : > { %1712 = vmatprep.mubr.bf16.mxu1 %v1242_v36  ;;  %1672 = vmatmul.mubr.bf16.vlgmr.msra.gmra.mxu0 %v1239_v35  ;;  %v4220_v35 = vld [vmem:[%s5451_s10 + $0x8] sm:$0xff]   ;;  %v4221_v36 = vld [vmem:[%s5451_s10] sm:$0xff]  }
 0x1a6   : > { %1713 = vmatmul.mubr.bf16.vlgmr.msra.gmra.mxu1 %v1241_v32  ;;  %3820 = vmatpush3.bf16.msra.mxu0 %v4191_v34 }
 0x1a7   : > { %3821 = vmatprep.subr.bf16.mxu0 %v4192_v37  ;;  %3860 = vmatpush3.bf16.msra.mxu1 %v4206_v51  ;;  %v4222_v37 = vld [vmem:[#allocation7 + $0x70] ss:$8 sps:$4 sm:$0xff]  }
 0x1a8   : > { %3861 = vmatprep.subr.bf16.mxu1 %v4713_v52  ;;  %3875 = vmatprep.mubr.msk.bf16.mxu1 %vm4714_vm0, %v4713_v52 }
 0x1aa   : > { %3822 = vmatpush3.bf16.msra.mxu0 %v4193_v38  ;;  %v4224_v38 = vld [vmem:[#allocation7 + $0x74] ss:$8 sps:$4 sm:$0xff]  }
 0x1ab   : > { %3823 = vmatprep.subr.bf16.mxu0 %v4194_v39  ;;  %3862 = vmatpush3.bf16.msra.mxu1 %v4207_v53  ;;  %v4227_v39 = vld [vmem:[#allocation7 + $0x64] ss:$8 sps:$4 sm:$0xff]  }
 0x1ac   : > { %3863 = vmatprep.subr.bf16.mxu1 %v4713_v52 }
 0x1ae   : > { %3824 = vmatpush3.bf16.msra.mxu0 %v4195_v40  ;;  %v4225_v40 = vld [vmem:[#allocation7 + $0x60] ss:$8 sps:$4 sm:$0xff]  }
 0x1af   : > { %3825 = vmatprep.subr.bf16.mxu0 %v4196_v41  ;;  %3864 = vmatpush3.bf16.msra.mxu1 %v4208_v14  ;;  %v4230_v41 = vld [vmem:[#allocation7 + $0x54] ss:$8 sps:$4 sm:$0xff]   ;;  %v4270_v14 = vld [vmem:[#allocation8 + $0x60] ss:$16 sps:$4 sm:$0xff]  }
 0x1b0   : > { %3865 = vmatprep.subr.bf16.mxu1 %v4713_v52 }
 0x1b2   : > { %3826 = vmatpush3.bf16.msra.mxu0 %v4197_v42  ;;  %v4228_v42 = vld [vmem:[#allocation7 + $0x50] ss:$8 sps:$4 sm:$0xff]  }
 0x1b3   : > { %3827 = vmatprep.subr.bf16.mxu0 %v4198_v43  ;;  %3866 = vmatpush3.bf16.msra.mxu1 %v4209_v15  ;;  %v4233_v43 = vld [vmem:[#allocation7 + $0x44] ss:$8 sps:$4 sm:$0xff]  }
 0x1b4   : > { %3867 = vmatprep.subr.bf16.mxu1 %v4713_v52  ;;  %v4278_v15 = vld [vmem:[#allocation8 + $0x44] ss:$16 sps:$4 sm:$0xff]  }
 0x1b6   : > { %3828 = vmatpush3.bf16.msra.mxu0 %v4199_v44  ;;  %v4231_v44 = vld [vmem:[#allocation7 + $0x40] ss:$8 sps:$4 sm:$0xff]  }
 0x1b7   : > { %3829 = vmatprep.subr.bf16.mxu0 %v4200_v45  ;;  %3868 = vmatpush3.bf16.msra.mxu1 %v4210_v16  ;;  %v3648_v45 = vld [vmem:[%s5450_s9] ss:$0 sm:$0xff] }
 0x1b8   : > { %3869 = vmatprep.subr.bf16.mxu1 %v4713_v52  ;;  %v4276_v16 = vld [vmem:[#allocation8 + $0x40] ss:$16 sps:$4 sm:$0xff]  }
 0x1ba   : > { %3830 = vmatpush3.bf16.msra.mxu0 %v4201_v46 }
 0x1bb   : > { %3831 = vmatprep.subr.bf16.mxu0 %v4202_v47  ;;  %3870 = vmatpush3.bf16.msra.mxu1 %v4211_v17  ;;  %v2014_v47 = vld [vmem:[%s737_s23] sm:$0xff]  ;;  %s3268_s23 = scalar_lea.sflag [#allocation4], %s4980_s25 }
 0x1bc   : > { %3871 = vmatprep.subr.bf16.mxu1 %v4713_v52  ;;  %v4284_v17 = vld [vmem:[#allocation8 + $0x24] ss:$16 sps:$4 sm:$0xff]  }
 0x1be   : > { %3832 = vmatpush3.bf16.msra.mxu0 %v4203_v48 }
 0x1bf   : > { %3833 = vmatprep.subr.bf16.mxu0 %v4204_v49  ;;  %3872 = vmatpush3.bf16.msra.mxu1 %v4212_v18  ;;  %v4282_v18 = vld [vmem:[#allocation8 + $0x20] ss:$16 sps:$4 sm:$0xff]  }
 0x1c0   : > { %3873 = vmatprep.subr.bf16.mxu1 %v4713_v52 }
 0x1c2   : > { %3834 = vmatpush3.bf16.msra.mxu0 %v4205_v50 }
 0x1c3   : > { %3879 = vmatprep.subr.bf16.mxu0 %v4713_v52  ;;  %3874 = vmatpush3.bf16.msra.mxu1 %v4213_v19  ;;  %v4290_v19 = vld [vmem:[#allocation8 + $0x4] ss:$16 sps:$4 sm:$0xff]  }
 0x1c4   : > { %2238 = vmatprep.subr.bf16.mxu1 %v4224_v38  ;;  %v4263_v38 = vld [vmem:[#allocation8 + $0xac] ss:$16 sps:$4 sm:$0xff]  }
 0x265   : > { %v1673_v57 = vpop.f32.mrf.mxu0 }
 0x266   : > { %v1674_v58 = vadd.f32 %v1673_v57, %v1312_v55  ;;  %v1714_v59 = vpop.f32.mrf.mxu1  ;;  %v4234_v55 = vld [vmem:[#allocation7 + $0x30] ss:$8 sps:$4 sm:$0xff]   ;;  %v4237_v57 = vld [vmem:[#allocation7 + $0x20] ss:$8 sps:$4 sm:$0xff]  }
 0x267   : > { %v1675_v60 = vpop.f32.mrf.mxu0 }
 0x268   : > { %v1715_v61 = vadd.f32 %v1714_v59, %v1674_v58  ;;  %v1676_v62 = vadd.f32 %v1675_v60, %v1316_v56  ;;  %v1716_v63 = vpop.f32.mrf.mxu1  ;;  %v4239_v56 = vld [vmem:[#allocation7 + $0x24] ss:$8 sps:$4 sm:$0xff]   ;;  %v4242_v58 = vld [vmem:[#allocation7 + $0x14] ss:$8 sps:$4 sm:$0xff]   ;;  %v4240_v59 = vld [vmem:[#allocation7 + $0x10] ss:$8 sps:$4 sm:$0xff]  }
 0x269   : > { %v1677_v0 = vpop.f32.mrf.mxu0  ;;  %v4245_v60 = vld [vmem:[#allocation7 + $0x4] ss:$8 sps:$4 sm:$0xff]  }
 0x26a   : > { %v1717_v1 = vadd.f32 %v1716_v63, %v1676_v62  ;;  %v1718_v2 = vpop.f32.mrf.mxu1  ;;  %4446 = vtanh.f32 %v1715_v61  ;;  %v4243_v61 = vld [vmem:[#allocation7] ss:$8 sps:$4 sm:$0xff]   ;;  %v4715_v62 = vmov 0   ;;  %v4248_v0 = vld [vmem:[#allocation8 + $0xe4] ss:$16 sps:$4 sm:$0xff]  }
 0x26b   : > { %v1678_v3 = vpop.f32.mrf.mxu0  ;;  %v4246_v63 = vld [vmem:[#allocation8 + $0xe0] ss:$16 sps:$4 sm:$0xff]   ;;  %v4254_v2 = vld [vmem:[#allocation8 + $0xc4] ss:$16 sps:$4 sm:$0xff]  }
 0x26c   : > { %4448 = vtanh.f32 %v1717_v1  ;;  %v1719_v4 = vpop.f32.mrf.mxu1  ;;  %v4251_v1 = vld [vmem:[#allocation8 + $0xec] ss:$16 sps:$4 sm:$0xff]   ;;  %v4252_v3 = vld [vmem:[#allocation8 + $0xc0] ss:$16 sps:$4 sm:$0xff]  }
 0x26d   : > { %v4260_v4 = vld [vmem:[#allocation8 + $0xa4] ss:$16 sps:$4 sm:$0xff]  }
 0x277   : > { %v4447_v5 = vpop.eup %4446 }
 0x278   : > { %v1723_v13 = vpack.c.bf16 %v4447_v5, %v4447_v5  ;;  %v4258_v5 = vld [vmem:[#allocation8 + $0xa0] ss:$16 sps:$4 sm:$0xff]  }
 0x279   : > { %v4449_v9 = vpop.eup %4448 }
 0x27a   : > { %v1724_v12 = vpack.c.bf16 %v4449_v9, %v4449_v9  ;;  %v4266_v9 = vld [vmem:[#allocation8 + $0x84] ss:$16 sps:$4 sm:$0xff]  }
 0x27c   : > { %1892 = vmatprep.mubr.bf16.mxu0 %v1724_v12  ;;  %v4264_v12 = vld [vmem:[#allocation8 + $0x80] ss:$16 sps:$4 sm:$0xff]  }
 0x27d   : > { %1893 = vmatmul.mubr.bf16.vlgmr.msra.gmra.mxu0 %v1723_v13  ;;  %v4272_v13 = vld [vmem:[#allocation8 + $0x64] ss:$16 sps:$4 sm:$0xff]  }
 0x27e   : > { %3895 = vmatprep.mubr.msk.bf16.mxu0 %vm4714_vm0, %v4713_v52  ;;  %3880 = vmatpush3.bf16.msra.mxu0 %v4214_v20  ;;  %v4288_v20 = vld [vmem:[#allocation8] ss:$16 sps:$4 sm:$0xff]  }
 0x27f   : > { %3881 = vmatprep.subr.bf16.mxu0 %v4713_v52 }
 0x282   : > { %3882 = vmatpush3.bf16.msra.mxu0 %v4215_v21  ;;  %v4296_v21 = vld [vmem:[#allocation8 + $0x1e4] ss:$16 sps:$4 sm:$0xff]  }
 0x283   : > { %3883 = vmatprep.subr.bf16.mxu0 %v4713_v52 }
 0x286   : > { %3884 = vmatpush3.bf16.msra.mxu0 %v4216_v22  ;;  %v4294_v22 = vld [vmem:[#allocation8 + $0x1e0] ss:$16 sps:$4 sm:$0xff]  }
 0x287   : > { %3885 = vmatprep.subr.bf16.mxu0 %v4713_v52 }
 0x28a   : > { %3886 = vmatpush3.bf16.msra.mxu0 %v4217_v23  ;;  %v4302_v23 = vld [vmem:[#allocation8 + $0x1c4] ss:$16 sps:$4 sm:$0xff]  }
 0x28b   : > { %3887 = vmatprep.subr.bf16.mxu0 %v4713_v52 }
 0x28e   : > { %3888 = vmatpush3.bf16.msra.mxu0 %v4218_v24  ;;  %v4300_v24 = vld [vmem:[#allocation8 + $0x1c0] ss:$16 sps:$4 sm:$0xff]  }
 0x28f   : > { %3889 = vmatprep.subr.bf16.mxu0 %v4713_v52 }
 0x292   : > { %3890 = vmatpush3.bf16.msra.mxu0 %v4219_v25  ;;  %v4308_v25 = vld [vmem:[#allocation8 + $0x1a4] ss:$16 sps:$4 sm:$0xff]  }
 0x293   : > { %3891 = vmatprep.subr.bf16.mxu0 %v4713_v52 }
 0x296   : > { %3892 = vmatpush3.bf16.msra.mxu0 %v4220_v35 }
 0x297   : > { %3893 = vmatprep.subr.bf16.mxu0 %v4713_v52 }
 0x29a   : > { %3894 = vmatpush3.bf16.msra.mxu0 %v4221_v36  ;;  %v4257_v36 = vld [vmem:[#allocation8 + $0xcc] ss:$16 sps:$4 sm:$0xff]  }
 0x29b   : > { %2689 = vmatprep.subr.bf16.mxu0 %v4248_v0  ;;  %v4326_v0 = vld [vmem:[#allocation8 + $0x144] ss:$16 sps:$4 sm:$0xff]  }
 0x33d   : > { %v3835_v26 = vpop.f32.mrf.mxu0 }
 0x33f   : > { %v3836_v28 = vpop.f32.mrf.mxu0 }
 0x340   : > { %v3837_v29 = vadd.f32 %v3836_v28, %v3835_v26  ;;  %v4306_v26 = vld [vmem:[#allocation8 + $0x1a0] ss:$16 sps:$4 sm:$0xff]  }
 0x341   : > { %v3838_v30 = vpop.f32.mrf.mxu0 }
 0x342   : > { %v1895_v31 = vadd.f32 %v3837_v29, %v3631_v27  ;;  %v3657_v27 = vld [vmem:[%s5452_s11] ss:$0 sm:$0xff] }
 0x343   : > { %v3839_v32 = vpop.f32.mrf.mxu0 }
 0x344   : > { %4450 = vtanh.f32 %v1895_v31 }
 0x351   : > { %v4451_v33 = vpop.eup %4450 }
 0x352   : > { %v1901_v34 = vpack.c.bf16 %v4451_v33, %v4451_v33 }
 0x354   : > { %3876 = vmatmul.mubr.bf16.vlgmr.msra.gmra.mxu1 %v1901_v34  ;;  %v4249_v34 = vld [vmem:[#allocation8 + $0xe8] ss:$16 sps:$4 sm:$0xff]  }
 0x355   : > { %2239 = vmatpush1.bf16.msra.mxu1 %v4222_v37  ;;  %2270 = vmatprep.mubr.bf16.mxu1 %v4715_v62  ;;  %v4255_v37 = vld [vmem:[#allocation8 + $0xc8] ss:$16 sps:$4 sm:$0xff]   ;;  %v4318_v62 = vld [vmem:[#allocation8 + $0x160] ss:$16 sps:$4 sm:$0xff]  }
 0x356   : > { %2240 = vmatprep.subr.bf16.mxu1 %v4227_v39  ;;  %v4261_v39 = vld [vmem:[#allocation8 + $0xa8] ss:$16 sps:$4 sm:$0xff]  }
 0x359   : > { %2241 = vmatpush1.bf16.msra.mxu1 %v4225_v40  ;;  %v4269_v40 = vld [vmem:[#allocation8 + $0x8c] ss:$16 sps:$4 sm:$0xff]  }
 0x35a   : > { %2242 = vmatprep.subr.bf16.mxu1 %v4230_v41  ;;  %v4267_v41 = vld [vmem:[#allocation8 + $0x88] ss:$16 sps:$4 sm:$0xff]  }
 0x35d   : > { %2243 = vmatpush1.bf16.msra.mxu1 %v4228_v42  ;;  %v4275_v42 = vld [vmem:[#allocation8 + $0x6c] ss:$16 sps:$4 sm:$0xff]  }
 0x35e   : > { %2244 = vmatprep.subr.bf16.mxu1 %v4233_v43  ;;  %v4273_v43 = vld [vmem:[#allocation8 + $0x68] ss:$16 sps:$4 sm:$0xff]  }
 0x361   : > { %2245 = vmatpush1.bf16.msra.mxu1 %v4231_v44  ;;  %v4281_v44 = vld [vmem:[#allocation8 + $0x4c] ss:$16 sps:$4 sm:$0xff]  }
 0x362   : > { %2246 = vmatprep.subr.bf16.mxu1 %v4236_v54  ;;  %v4311_v54 = vld [vmem:[#allocation8 + $0x1ac] ss:$16 sps:$4 sm:$0xff]  }
 0x365   : > { %2247 = vmatpush1.bf16.msra.mxu1 %v4234_v55  ;;  %v4309_v55 = vld [vmem:[#allocation8 + $0x1a8] ss:$16 sps:$4 sm:$0xff]  }
 0x366   : > { %2248 = vmatprep.subr.bf16.mxu1 %v4239_v56  ;;  %v4314_v56 = vld [vmem:[#allocation8 + $0x184] ss:$16 sps:$4 sm:$0xff]  }
 0x369   : > { %2249 = vmatpush1.bf16.msra.mxu1 %v4237_v57  ;;  %v4317_v57 = vld [vmem:[#allocation8 + $0x18c] ss:$16 sps:$4 sm:$0xff]  }
 0x36a   : > { %2250 = vmatprep.subr.bf16.mxu1 %v4242_v58  ;;  %v4312_v58 = vld [vmem:[#allocation8 + $0x180] ss:$16 sps:$4 sm:$0xff]  }
 0x36d   : > { %2251 = vmatpush1.bf16.msra.mxu1 %v4240_v59  ;;  %v4315_v59 = vld [vmem:[#allocation8 + $0x188] ss:$16 sps:$4 sm:$0xff]  }
 0x36e   : > { %2252 = vmatprep.subr.bf16.mxu1 %v4245_v60  ;;  %v4320_v60 = vld [vmem:[#allocation8 + $0x164] ss:$16 sps:$4 sm:$0xff]  }
 0x371   : > { %2253 = vmatpush1.bf16.msra.mxu1 %v4243_v61  ;;  %v4323_v61 = vld [vmem:[#allocation8 + $0x16c] ss:$16 sps:$4 sm:$0xff]  }
 0x372   : > { %2730 = vmatprep.subr.bf16.mxu1 %v4251_v1  ;;  %v4329_v1 = vld [vmem:[#allocation8 + $0x14c] ss:$16 sps:$4 sm:$0xff]  }
 0x414   : > { %v2007_v46 = vpop.f32.mrf.mxu1 }
 0x415   : > { %v2008_v48 = vadd.f32 %v3648_v45, %v2007_v46  ;;  %v4279_v45 = vld [vmem:[#allocation8 + $0x48] ss:$16 sps:$4 sm:$0xff]   ;;  %v4287_v46 = vld [vmem:[#allocation8 + $0x2c] ss:$16 sps:$4 sm:$0xff]  }
 0x416   : > { %v3877_v49 = vpop.f32.mrf.mxu1 }
 0x417   : > { %2013 = vst [vmem:[%s5349_s21] sm:$0xff] %v2008_v48  ;;  %v2015_v50 = vadd.f32 %v2014_v47, %v2008_v48  ;;  %v4285_v47 = vld [vmem:[#allocation8 + $0x28] ss:$16 sps:$4 sm:$0xff]   ;;  %v4293_v48 = vld [vmem:[#allocation8 + $0xc] ss:$16 sps:$4 sm:$0xff]  }
 0x418   : > { %v2010_v51 = vpop.f32.mrf.mxu1  ;;  %v4291_v49 = vld [vmem:[#allocation8 + $0x8] ss:$16 sps:$4 sm:$0xff]  }
 0x419   : > { %v2016_v52 = vpack.c.bf16 %v2015_v50, %v2015_v50  ;;  %v4299_v50 = vld [vmem:[#allocation8 + $0x1ec] ss:$16 sps:$4 sm:$0xff]   ;;  %v4297_v51 = vld [vmem:[#allocation8 + $0x1e8] ss:$16 sps:$4 sm:$0xff]  }
 0x41a   : > { %v3878_v53 = vpop.f32.mrf.mxu1 }
 0x41b   : > { %3896 = vmatmul.mubr.bf16.vlgmr.msra.gmra.mxu0 %v2016_v52  ;;  %v4305_v52 = vld [vmem:[#allocation8 + $0x1cc] ss:$16 sps:$4 sm:$0xff]   ;;  %v4303_v53 = vld [vmem:[#allocation8 + $0x1c8] ss:$16 sps:$4 sm:$0xff]  }
 0x41c   : > { %2690 = vmatpush1.bf16.msra.mxu0 %v4246_v63  ;;  %v4321_v63 = vld [vmem:[#allocation8 + $0x168] ss:$16 sps:$4 sm:$0xff]  }
 0x41d   : > { %2691 = vmatprep.subr.bf16.mxu0 %v4254_v2  ;;  %v4324_v2 = vld [vmem:[#allocation8 + $0x140] ss:$16 sps:$4 sm:$0xff]  }
 0x420   : > { %2692 = vmatpush1.bf16.msra.mxu0 %v4252_v3  ;;  %v4327_v3 = vld [vmem:[#allocation8 + $0x148] ss:$16 sps:$4 sm:$0xff]  }
 0x421   : > { %2693 = vmatprep.subr.bf16.mxu0 %v4260_v4  ;;  %v4332_v4 = vld [vmem:[#allocation8 + $0x124] ss:$16 sps:$4 sm:$0xff]  }
 0x424   : > { %2694 = vmatpush1.bf16.msra.mxu0 %v4258_v5  ;;  %v4335_v5 = vld [vmem:[#allocation8 + $0x12c] ss:$16 sps:$4 sm:$0xff]  }
 0x425   : > { %2695 = vmatprep.subr.bf16.mxu0 %v4266_v9  ;;  %v4330_v9 = vld [vmem:[#allocation8 + $0x120] ss:$16 sps:$4 sm:$0xff]  }
 0x428   : > { %2696 = vmatpush1.bf16.msra.mxu0 %v4264_v12  ;;  %v4333_v12 = vld [vmem:[#allocation8 + $0x128] ss:$16 sps:$4 sm:$0xff]  }
 0x429   : > { %2697 = vmatprep.subr.bf16.mxu0 %v4272_v13  ;;  %v4336_v13 = vld [vmem:[#allocation8 + $0x100] ss:$16 sps:$4 sm:$0xff]  }
 0x42c   : > { %2698 = vmatpush1.bf16.msra.mxu0 %v4270_v14  ;;  %v4338_v14 = vld [vmem:[#allocation8 + $0x104] ss:$16 sps:$4 sm:$0xff]  }
 0x42d   : > { %2699 = vmatprep.subr.bf16.mxu0 %v4278_v15  ;;  %v4339_v15 = vld [vmem:[#allocation8 + $0x108] ss:$16 sps:$4 sm:$0xff]  }
 0x430   : > { %2700 = vmatpush1.bf16.msra.mxu0 %v4276_v16  ;;  %v4341_v16 = vld [vmem:[#allocation8 + $0x10c] ss:$16 sps:$4 sm:$0xff]  }
 0x431   : > { %2701 = vmatprep.subr.bf16.mxu0 %v4284_v17  ;;  %v4344_v17 = vld [vmem:[#allocation10 + $0x74] ss:$8 sps:$4 sm:$0xff]  }
 0x434   : > { %2702 = vmatpush1.bf16.msra.mxu0 %v4282_v18  ;;  %v4347_v18 = vld [vmem:[#allocation10 + $0x174] ss:$8 sps:$4 sm:$0xff]  }
 0x435   : > { %2703 = vmatprep.subr.bf16.mxu0 %v4290_v19  ;;  %v2146_v19 = vld [vmem:[%s5454_s13] sm:$0x3] }
 0x438   : > { %2704 = vmatpush1.bf16.msra.mxu0 %v4288_v20  ;;  %v2151_v20 = vrot.slane %v2146_v19, %v5200_v7 }
 0x439   : > { %2705 = vmatprep.subr.bf16.mxu0 %v4296_v21  ;;  %v2155_v21 = vrot.slane %v2146_v19, %v5207_v10  ;;  %v4416_v19 = vld [vmem:[#allocation10 + $0xb4] ss:$8 sps:$4 sm:$0xff]  }
 0x43c   : > { %2706 = vmatpush2.bf16.msra.mxu0 %v4294_v22 }
 0x43d   : > { %2707 = vmatprep.subr.bf16.mxu0 %v4302_v23 }
 0x440   : > { %2708 = vmatpush2.bf16.msra.mxu0 %v4300_v24 }
 0x441   : > { %2709 = vmatprep.subr.bf16.mxu0 %v4308_v25 }
 0x444   : > { %2710 = vmatpush2.bf16.msra.mxu0 %v4306_v26 }
 0x445   : > { %2711 = vmatprep.subr.bf16.mxu0 %v4314_v56  ;;  %v4378_v56 = vld [vmem:[#allocation10 + $0x10] ss:$8 sps:$4 sm:$0xff]  }
 0x448   : > { %2712 = vmatpush2.bf16.msra.mxu0 %v4312_v58  ;;  %v4386_v58 = vld [vmem:[#allocation10 + $0x4] ss:$8 sps:$4 sm:$0xff]  }
 0x449   : > { %2713 = vmatprep.subr.bf16.mxu0 %v4320_v60  ;;  %v4384_v60 = vld [vmem:[#allocation10] ss:$8 sps:$4 sm:$0xff]  }
 0x44c   : > { %2714 = vmatpush2.bf16.msra.mxu0 %v4318_v62  ;;  %v4392_v62 = vld [vmem:[#allocation10 + $0xf4] ss:$8 sps:$4 sm:$0xff]  }
 0x44d   : > { %2715 = vmatprep.subr.bf16.mxu0 %v4326_v0  ;;  %v4390_v0 = vld [vmem:[#allocation10 + $0xf0] ss:$8 sps:$4 sm:$0xff]  }
 0x450   : > { %2716 = vmatpush2.bf16.msra.mxu0 %v4324_v2  ;;  %v4398_v2 = vld [vmem:[#allocation10 + $0xe4] ss:$8 sps:$4 sm:$0xff]  }
 0x451   : > { %2717 = vmatprep.subr.bf16.mxu0 %v4332_v4  ;;  %v4396_v4 = vld [vmem:[#allocation10 + $0xe0] ss:$8 sps:$4 sm:$0xff]  }
 0x454   : > { %2718 = vmatpush2.bf16.msra.mxu0 %v4330_v9  ;;  %v4404_v9 = vld [vmem:[#allocation10 + $0xd4] ss:$8 sps:$4 sm:$0xff]  }
 0x455   : > { %2719 = vmatprep.subr.bf16.mxu0 %v4338_v14  ;;  %v4405_v14 = vld [vmem:[#allocation10 + $0x1d0] ss:$8 sps:$4 sm:$0xff]  }
 0x458   : > { %2720 = vmatpush2.bf16.msra.mxu0 %v4336_v13  ;;  %v4402_v13 = vld [vmem:[#allocation10 + $0xd0] ss:$8 sps:$4 sm:$0xff]  }
 0x459   : > { %3175 = vmatprep.subr.bf16.mxu0 %v4344_v17  ;;  %v4408_v17 = vld [vmem:[#allocation10 + $0xc0] ss:$8 sps:$4 sm:$0xff]  }
 0x4db   : > { %v2122_v28 = vpop.f32.mrf.mxu0 }
 0x4dc   : > { %v2123_v29 = vadd.f32 %v3657_v27, %v2122_v28 }
 0x4dd   : > { %v3897_v30 = vpop.f32.mrf.mxu0 }
 0x4de   : > { %4452 = vtanh.f32 %v2123_v29 }
 0x4df   : > { %v2125_v31 = vpop.f32.mrf.mxu0 }
 0x4e0   : > { %v4342_v31 = vld [vmem:[#allocation10 + $0x70] ss:$8 sps:$4 sm:$0xff]  }
 0x4e1   : > { %v3898_v32 = vpop.f32.mrf.mxu0 }
 0x4e2   : > { %v4345_v32 = vld [vmem:[#allocation10 + $0x170] ss:$8 sps:$4 sm:$0xff]  }
 0x4eb   : > { %v4453_v33 = vpop.eup %4452 }
 0x4ec   : > { %v2129_v35 = vpack.c.bf16 %v4453_v33, %v4453_v33 }
 0x4ee   : > { %2271 = vmatmul.mubr.bf16.vlgmr.msra.gmra.mxu1 %v2129_v35  ;;  %v4353_v35 = vld [vmem:[#allocation10 + $0x164] ss:$8 sps:$4 sm:$0xff]  }
 0x4ef   : > { %2731 = vmatpush1.bf16.msra.mxu1 %v4249_v34  ;;  %v4350_v34 = vld [vmem:[#allocation10 + $0x64] ss:$8 sps:$4 sm:$0xff]  }
 0x4f0   : > { %2732 = vmatprep.subr.bf16.mxu1 %v4257_v36  ;;  %v4348_v36 = vld [vmem:[#allocation10 + $0x60] ss:$8 sps:$4 sm:$0xff]  }
 0x4f3   : > { %2733 = vmatpush1.bf16.msra.mxu1 %v4255_v37  ;;  %v4351_v37 = vld [vmem:[#allocation10 + $0x160] ss:$8 sps:$4 sm:$0xff]  }
 0x4f4   : > { %2734 = vmatprep.subr.bf16.mxu1 %v4263_v38  ;;  %v4356_v38 = vld [vmem:[#allocation10 + $0x54] ss:$8 sps:$4 sm:$0xff]  }
 0x4f7   : > { %2735 = vmatpush1.bf16.msra.mxu1 %v4261_v39  ;;  %v4359_v39 = vld [vmem:[#allocation10 + $0x154] ss:$8 sps:$4 sm:$0xff]  }
 0x4f8   : > { %2736 = vmatprep.subr.bf16.mxu1 %v4269_v40  ;;  %v4354_v40 = vld [vmem:[#allocation10 + $0x50] ss:$8 sps:$4 sm:$0xff]  }
 0x4fb   : > { %2737 = vmatpush1.bf16.msra.mxu1 %v4267_v41  ;;  %v4357_v41 = vld [vmem:[#allocation10 + $0x150] ss:$8 sps:$4 sm:$0xff]  }
 0x4fc   : > { %2738 = vmatprep.subr.bf16.mxu1 %v4275_v42  ;;  %v4362_v42 = vld [vmem:[#allocation10 + $0x44] ss:$8 sps:$4 sm:$0xff]  }
 0x4ff   : > { %2739 = vmatpush1.bf16.msra.mxu1 %v4273_v43  ;;  %v4365_v43 = vld [vmem:[#allocation10 + $0x144] ss:$8 sps:$4 sm:$0xff]  }
 0x500   : > { %2740 = vmatprep.subr.bf16.mxu1 %v4281_v44  ;;  %v4360_v44 = vld [vmem:[#allocation10 + $0x40] ss:$8 sps:$4 sm:$0xff]  }
 0x503   : > { %2741 = vmatpush1.bf16.msra.mxu1 %v4279_v45  ;;  %v4363_v45 = vld [vmem:[#allocation10 + $0x140] ss:$8 sps:$4 sm:$0xff]  }
 0x504   : > { %2742 = vmatprep.subr.bf16.mxu1 %v4287_v46  ;;  %v4368_v46 = vld [vmem:[#allocation10 + $0x34] ss:$8 sps:$4 sm:$0xff]  }
 0x507   : > { %2743 = vmatpush1.bf16.msra.mxu1 %v4285_v47  ;;  %v4371_v47 = vld [vmem:[#allocation10 + $0x134] ss:$8 sps:$4 sm:$0xff]  }
 0x508   : > { %2744 = vmatprep.subr.bf16.mxu1 %v4293_v48  ;;  %v4366_v48 = vld [vmem:[#allocation10 + $0x30] ss:$8 sps:$4 sm:$0xff]  }
 0x50b   : > { %2745 = vmatpush1.bf16.msra.mxu1 %v4291_v49  ;;  %v4369_v49 = vld [vmem:[#allocation10 + $0x130] ss:$8 sps:$4 sm:$0xff]  }
 0x50c   : > { %2746 = vmatprep.subr.bf16.mxu1 %v4299_v50  ;;  %v4374_v50 = vld [vmem:[#allocation10 + $0x24] ss:$8 sps:$4 sm:$0xff]  }
 0x50f   : > { %2747 = vmatpush2.bf16.msra.mxu1 %v4297_v51  ;;  %v4377_v51 = vld [vmem:[#allocation10 + $0x124] ss:$8 sps:$4 sm:$0xff]  }
 0x510   : > { %2748 = vmatprep.subr.bf16.mxu1 %v4305_v52  ;;  %v4372_v52 = vld [vmem:[#allocation10 + $0x20] ss:$8 sps:$4 sm:$0xff]  }
 0x513   : > { %2749 = vmatpush2.bf16.msra.mxu1 %v4303_v53  ;;  %v4375_v53 = vld [vmem:[#allocation10 + $0x120] ss:$8 sps:$4 sm:$0xff]  }
 0x514   : > { %2750 = vmatprep.subr.bf16.mxu1 %v4311_v54  ;;  %v4380_v54 = vld [vmem:[#allocation10 + $0x14] ss:$8 sps:$4 sm:$0xff]  }
 0x517   : > { %2751 = vmatpush2.bf16.msra.mxu1 %v4309_v55  ;;  %v4383_v55 = vld [vmem:[#allocation10 + $0x114] ss:$8 sps:$4 sm:$0xff]  }
 0x518   : > { %2752 = vmatprep.subr.bf16.mxu1 %v4317_v57  ;;  %v4381_v57 = vld [vmem:[#allocation10 + $0x110] ss:$8 sps:$4 sm:$0xff]  }
 0x51b   : > { %2753 = vmatpush2.bf16.msra.mxu1 %v4315_v59  ;;  %v4389_v59 = vld [vmem:[#allocation10 + $0x104] ss:$8 sps:$4 sm:$0xff]  }
 0x51c   : > { %2754 = vmatprep.subr.bf16.mxu1 %v4323_v61  ;;  %v4387_v61 = vld [vmem:[#allocation10 + $0x100] ss:$8 sps:$4 sm:$0xff]  }
 0x51f   : > { %2755 = vmatpush2.bf16.msra.mxu1 %v4321_v63  ;;  %v4395_v63 = vld [vmem:[#allocation10 + $0x1f4] ss:$8 sps:$4 sm:$0xff]  }
 0x520   : > { %2756 = vmatprep.subr.bf16.mxu1 %v4329_v1  ;;  %v4393_v1 = vld [vmem:[#allocation10 + $0x1f0] ss:$8 sps:$4 sm:$0xff]  }
 0x523   : > { %2757 = vmatpush2.bf16.msra.mxu1 %v4327_v3  ;;  %v4401_v3 = vld [vmem:[#allocation10 + $0x1e4] ss:$8 sps:$4 sm:$0xff]  }
 0x524   : > { %2758 = vmatprep.subr.bf16.mxu1 %v4335_v5  ;;  %v4399_v5 = vld [vmem:[#allocation10 + $0x1e0] ss:$8 sps:$4 sm:$0xff]  }
 0x527   : > { %2759 = vmatpush2.bf16.msra.mxu1 %v4333_v12  ;;  %v4407_v12 = vld [vmem:[#allocation10 + $0x1d4] ss:$8 sps:$4 sm:$0xff]  }
 0x528   : > { %2760 = vmatprep.subr.bf16.mxu1 %v4341_v16  ;;  %v4413_v16 = vld [vmem:[#allocation10 + $0x1c4] ss:$8 sps:$4 sm:$0xff]  }
 0x52b   : > { %2761 = vmatpush2.bf16.msra.mxu1 %v4339_v15  ;;  %v4410_v15 = vld [vmem:[#allocation10 + $0xc4] ss:$8 sps:$4 sm:$0xff]  }
 0x52c   : > { %3216 = vmatprep.subr.bf16.mxu1 %v4347_v18  ;;  %v4411_v18 = vld [vmem:[#allocation10 + $0x1c0] ss:$8 sps:$4 sm:$0xff]  }
 0x5ae   : > { %v2272_v22 = vpop.f32.mrf.mxu1 }
 0x5af   : > { %v2273_v23 = vadd.f32 %v2272_v22, %v2151_v20  ;;  %v4419_v20 = vld [vmem:[#allocation10 + $0x1b4] ss:$8 sps:$4 sm:$0xff]   ;;  %v4417_v22 = vld [vmem:[#allocation10 + $0x1b0] ss:$8 sps:$4 sm:$0xff]  }
 0x5b0   : > { %v2274_v24 = vpop.f32.mrf.mxu1 }
 0x5b1   : > { %v2275_v25 = vadd.f32 %v2274_v24, %v2155_v21  ;;  %4454 = vtanh.f32 %v2273_v23  ;;  %v4414_v21 = vld [vmem:[#allocation10 + $0xb0] ss:$8 sps:$4 sm:$0xff]   ;;  %v4422_v23 = vld [vmem:[#allocation10 + $0xa4] ss:$8 sps:$4 sm:$0xff]  }
 0x5b2   : > { %v2276_v26 = vpop.f32.mrf.mxu1  ;;  %v4425_v24 = vld [vmem:[#allocation10 + $0x1a4] ss:$8 sps:$4 sm:$0xff]  }
 0x5b3   : > { %4456 = vtanh.f32 %v2275_v25  ;;  %v4420_v25 = vld [vmem:[#allocation10 + $0xa0] ss:$8 sps:$4 sm:$0xff]  }
 0x5b4   : > { %v2277_v27 = vpop.f32.mrf.mxu1  ;;  %v4423_v26 = vld [vmem:[#allocation10 + $0x1a0] ss:$8 sps:$4 sm:$0xff]  }
 0x5b5   : > { %v4428_v27 = vld [vmem:[#allocation10 + $0x94] ss:$8 sps:$4 sm:$0xff]  }
 0x5be   : > { %v4455_v28 = vpop.eup %4454 }
 0x5bf   : > { %v2281_v33 = vpack.c.bf16 %v4455_v28, %v4455_v28  ;;  %v4431_v28 = vld [vmem:[#allocation10 + $0x194] ss:$8 sps:$4 sm:$0xff]  }
 0x5c0   : > { %v4457_v29 = vpop.eup %4456 }
 0x5c1   : > { %v2282_v30 = vpack.c.bf16 %v4457_v29, %v4457_v29  ;;  %v4426_v29 = vld [vmem:[#allocation10 + $0x90] ss:$8 sps:$4 sm:$0xff]  }
 0x5c3   : > { %2721 = vmatprep.mubr.bf16.mxu0 %v2282_v30  ;;  %2762 = vmatprep.mubr.bf16.mxu1 %v2282_v30  ;;  %v4429_v30 = vld [vmem:[#allocation10 + $0x190] ss:$8 sps:$4 sm:$0xff]  }
 0x5c4   : > { %2722 = vmatmul.mubr.bf16.vlgmr.msra.gmra.mxu0 %v2281_v33  ;;  %2763 = vmatmul.mubr.bf16.vlgmr.msra.gmra.mxu1 %v2281_v33  ;;  %v4432_v33 = vld [vmem:[#allocation10 + $0x80] ss:$8 sps:$4 sm:$0xff]  }
 0x5c5   : > { %3176 = vmatpush1.bf16.msra.mxu0 %v4342_v31  ;;  %3217 = vmatpush1.bf16.msra.mxu1 %v4345_v32  ;;  %v4434_v31 = vld [vmem:[#allocation10 + $0x84] ss:$8 sps:$4 sm:$0xff]  }
 0x5c6   : > { %3177 = vmatprep.subr.bf16.mxu0 %v4350_v34  ;;  %3218 = vmatprep.subr.bf16.mxu1 %v4353_v35  ;;  %v4437_v32 = vld [vmem:[#allocation10 + $0x184] ss:$8 sps:$4 sm:$0xff]   ;;  %v4435_v34 = vld [vmem:[#allocation10 + $0x180] ss:$8 sps:$4 sm:$0xff]  }
 0x5c7   : > { %v2347_v35 = vld [vmem:[%s5456_s15] sm:$0xf] }
 0x5c9   : > { %3178 = vmatpush1.bf16.msra.mxu0 %v4348_v36  ;;  %3219 = vmatpush1.bf16.msra.mxu1 %v4351_v37  ;;  %v2352_v36 = vrot.slane %v2347_v35, %v5200_v7  ;;  %v2360_v37 = vrot.slane %v2347_v35, %v823_v8 }
 0x5ca   : > { %3179 = vmatprep.subr.bf16.mxu0 %v4356_v38  ;;  %3220 = vmatprep.subr.bf16.mxu1 %v4359_v39  ;;  %v2356_v38 = vrot.slane %v2347_v35, %v5207_v10  ;;  %v2364_v39 = vrot.slane %v2347_v35, %v827_v11 }
 0x5cd   : > { %3180 = vmatpush1.bf16.msra.mxu0 %v4354_v40  ;;  %3221 = vmatpush1.bf16.msra.mxu1 %v4357_v41 }
 0x5ce   : > { %3181 = vmatprep.subr.bf16.mxu0 %v4362_v42  ;;  %3222 = vmatprep.subr.bf16.mxu1 %v4365_v43 }
 0x5d1   : > { %3182 = vmatpush1.bf16.msra.mxu0 %v4360_v44  ;;  %3223 = vmatpush1.bf16.msra.mxu1 %v4363_v45 }
 0x5d2   : > { %3183 = vmatprep.subr.bf16.mxu0 %v4368_v46  ;;  %3224 = vmatprep.subr.bf16.mxu1 %v4371_v47 }
 0x5d5   : > { %3184 = vmatpush1.bf16.msra.mxu0 %v4366_v48  ;;  %3225 = vmatpush1.bf16.msra.mxu1 %v4369_v49 }
 0x5d6   : > { %3185 = vmatprep.subr.bf16.mxu0 %v4374_v50  ;;  %3226 = vmatprep.subr.bf16.mxu1 %v4377_v51 }
 0x5d9   : > { %3186 = vmatpush1.bf16.msra.mxu0 %v4372_v52  ;;  %3227 = vmatpush1.bf16.msra.mxu1 %v4375_v53 }
 0x5da   : > { %3187 = vmatprep.subr.bf16.mxu0 %v4380_v54  ;;  %3228 = vmatprep.subr.bf16.mxu1 %v4383_v55 }
 0x5dd   : > { %3188 = vmatpush1.bf16.msra.mxu0 %v4378_v56  ;;  %3229 = vmatpush1.bf16.msra.mxu1 %v4381_v57  ;;  %v2843_v57 = vld [vmem:[%s5458_s17] sm:$0x3] }
 0x5de   : > { %3189 = vmatprep.subr.bf16.mxu0 %v4386_v58  ;;  %3230 = vmatprep.subr.bf16.mxu1 %v4389_v59  ;;  %v2848_v58 = vrot.slane %v2843_v57, %v5200_v7  ;;  %v2852_v59 = vrot.slane %v2843_v57, %v5207_v10  ;;  %v4466_v10 = vld [vmem:[%s4986_s0] sm:$0xff] }
 0x5e1   : > { %3190 = vmatpush1.bf16.msra.mxu0 %v4384_v60  ;;  %3231 = vmatpush1.bf16.msra.mxu1 %v4387_v61 }
 0x5e2   : > { %3191 = vmatprep.subr.bf16.mxu0 %v4392_v62  ;;  %3232 = vmatprep.subr.bf16.mxu1 %v4395_v63 }
 0x5e5   : > { %3192 = vmatpush2.bf16.msra.mxu0 %v4390_v0  ;;  %3233 = vmatpush2.bf16.msra.mxu1 %v4393_v1 }
 0x5e6   : > { %3193 = vmatprep.subr.bf16.mxu0 %v4398_v2  ;;  %3234 = vmatprep.subr.bf16.mxu1 %v4401_v3 }
 0x5e9   : > { %3194 = vmatpush2.bf16.msra.mxu0 %v4396_v4  ;;  %3235 = vmatpush2.bf16.msra.mxu1 %v4399_v5 }
 0x5ea   : > { %3195 = vmatprep.subr.bf16.mxu0 %v4404_v9  ;;  %3236 = vmatprep.subr.bf16.mxu1 %v4407_v12 }
 0x5ed   : > { %3196 = vmatpush2.bf16.msra.mxu0 %v4402_v13  ;;  %3237 = vmatpush2.bf16.msra.mxu1 %v4405_v14  ;;  %v4467_v13 = vld [vmem:[%s4986_s0 + $0x8] sm:$0xff]  ;;  %s4604_s0 = sshll.u32 %s4716_s18, 4  ;;  %s4605_s0 = int_to_ptr.vmem [resolvable:$false] %s4604_s0 }
 0x5ee   : > { %3197 = vmatprep.subr.bf16.mxu0 %v4410_v15  ;;  %3238 = vmatprep.subr.bf16.mxu1 %v4413_v16  ;;  %s4606_s5 = scalar_lea.vmem %s4605_s0, 256  ;;  %p4607_p2 = scmp.lt.s32.totalorder %s3291_s19, %s4605_s0 }
 0x5ef   : > { %p4608_p9 = scmp.lt.s32.totalorder %s4606_s5, %s4600_s29 }
 0x5f1   : > { %3198 = vmatpush2.bf16.msra.mxu0 %v4408_v17  ;;  %3239 = vmatpush2.bf16.msra.mxu1 %v4411_v18  ;;  %p4609_p11 = por %p4608_p9, %p4607_p2 }
 0x5f2   : > { %3199 = vmatprep.subr.bf16.mxu0 %v4416_v19  ;;  %3240 = vmatprep.subr.bf16.mxu1 %v4419_v20 }
 0x5f3   : > { %p4610_p13 = pnand %p4609_p11, %p4603_p12 }
 0x5f5   : > { %3200 = vmatpush2.bf16.msra.mxu0 %v4414_v21  ;;  %3241 = vmatpush2.bf16.msra.mxu1 %v4417_v22 }
 0x5f6   : > { %3201 = vmatprep.subr.bf16.mxu0 %v4422_v23  ;;  %3242 = vmatprep.subr.bf16.mxu1 %v4425_v24 }
 0x5f9   : > { %3202 = vmatpush2.bf16.msra.mxu0 %v4420_v25  ;;  %3243 = vmatpush2.bf16.msra.mxu1 %v4423_v26 }
 0x5fa   : > { %3203 = vmatprep.subr.bf16.mxu0 %v4428_v27  ;;  %3244 = vmatprep.subr.bf16.mxu1 %v4431_v28 }
 0x5fd   : > { %3204 = vmatpush2.bf16.msra.mxu0 %v4426_v29  ;;  %3245 = vmatpush2.bf16.msra.mxu1 %v4429_v30 }
 0x5fe   : > { %3205 = vmatprep.subr.bf16.mxu0 %v4434_v31  ;;  %3246 = vmatprep.subr.bf16.mxu1 %v4437_v32 }
 0x601   : > { %3206 = vmatpush2.bf16.msra.mxu0 %v4432_v33  ;;  %3247 = vmatpush2.bf16.msra.mxu1 %v4435_v34 }
 0x684   : > { %v2723_v40 = vpop.f32.mrf.mxu0  ;;  %v2764_v41 = vpop.f32.mrf.mxu1 }
 0x685   : > { %v2724_v42 = vadd.f32 %v2723_v40, %v2352_v36  ;;  %v2765_v43 = vadd.f32 %v2764_v41, %v2360_v37 }
 0x686   : > { %v2725_v44 = vpop.f32.mrf.mxu0  ;;  %v2766_v45 = vpop.f32.mrf.mxu1 }
 0x687   : > { %4458 = vtanh.f32 %v2724_v42  ;;  %v2726_v46 = vadd.f32 %v2725_v44, %v2356_v38  ;;  %v2767_v47 = vadd.f32 %v2766_v45, %v2364_v39 }
 0x688   : > { %4460 = vtanh.f32 %v2765_v43  ;;  %v2727_v48 = vpop.f32.mrf.mxu0  ;;  %v2768_v49 = vpop.f32.mrf.mxu1 }
 0x689   : > { %4462 = vtanh.f32 %v2726_v46 }
 0x68a   : > { %4464 = vtanh.f32 %v2767_v47  ;;  %v2728_v8 = vpop.f32.mrf.mxu0  ;;  %v2769_v50 = vpop.f32.mrf.mxu1 }
 0x694   : > { %v4459_v51 = vpop.eup %4458 }
 0x695   : > { %v4461_v52 = vpop.eup %4460  ;;  %v2775_v54 = vpack.c.bf16 %v4459_v51, %v4459_v51 }
 0x696   : > { %v4463_v6 = vpop.eup %4462  ;;  %v2777_v56 = vpack.c.bf16 %v4461_v52, %v4461_v52 }
 0x697   : > { %v4465_v11 = vpop.eup %4464  ;;  %v2776_v53 = vpack.c.bf16 %v4463_v6, %v4463_v6 }
 0x698   : > { %v2778_v55 = vpack.c.bf16 %v4465_v11, %v4465_v11 }
 0x699   : > { %3207 = vmatprep.mubr.bf16.mxu0 %v2776_v53 }
 0x69a   : > { %3248 = vmatprep.mubr.bf16.mxu1 %v2778_v55  ;;  %3208 = vmatmul.mubr.bf16.vlgmr.msra.gmra.mxu0 %v2775_v54 }
 0x69b   : > { %3249 = vmatmul.mubr.bf16.vlgmr.msra.gmra.mxu1 %v2777_v56 }
 0x75a   : > { %v3209_v60 = vpop.f32.mrf.mxu0 }
 0x75b   : > { %v3210_v61 = vadd.f32 %v3209_v60, %v2848_v58  ;;  %v3250_v62 = vpop.f32.mrf.mxu1 }
 0x75c   : > { %v3211_v63 = vpop.f32.mrf.mxu0 }
 0x75d   : > { %v3251_v0 = vadd.f32 %v3250_v62, %v3210_v61  ;;  %v3212_v1 = vadd.f32 %v3211_v63, %v2852_v59  ;;  %v3252_v2 = vpop.f32.mrf.mxu1 }
 0x75e   : > { %v3213_v3 = vpop.f32.mrf.mxu0 }
 0x75f   : > { %3257 = vst [vmem:[%s5376_s27] sm:$0xff] %v3251_v0  ;;  %v3253_v7 = vadd.f32 %v3252_v2, %v3212_v1  ;;  %v3254_v4 = vpop.f32.mrf.mxu1  ;;  %v3259_v5 = vsub.f32 %v3251_v0, %v4466_v10 }
 0x760   : > { %v3214_v9 = vpop.f32.mrf.mxu0 }
 0x761   : > { %3258 = vst [vmem:[%s5376_s27 + $0x8] sm:$0xff] %v3253_v7  ;;  %v3255_v12 = vpop.f32.mrf.mxu1  ;;  %v3260_v14 = vsub.f32 %v3253_v7, %v4467_v13  ;;  %v3261_v15 = vmul.f32 %v3259_v5, %v3259_v5 }
 0x763   : > { %v3262_v16 = vmul.f32 %v3260_v14, %v3260_v14 }
 0x765   : > { %v3263_v17 = vadd.f32 %v3262_v16, %v3261_v15 }
 0x767   : > { %3264 = vadd.xlane.f32.xlu0 %v3263_v17 }
 0x768   : > { %4613 = shalt.err (!%p4610_p13)
}
 0x769   : > { %s4614_s21 = scalar_lea.hbm %s3288_s16, 128  ;;  %s4618_s2 = scalar_lea.hbm %s5521_s14, 256 }
 0x76a   : > { %p4615_p1 = scmp.ne.s32.totalorder %s3288_s16, %s4614_s21  ;;  %p4619_p6 = scmp.lt.s32.totalorder %s3288_s16, %s5521_s14 }
 0x76b   : > { %p4620_p5 = scmp.lt.s32.totalorder %s4618_s2, %s4614_s21 }
 0x76c   : > { %p4616_p3 = pnand %p4615_p1, %p5522_p10 }
 0x76d   : > { %p4621_p8 = por %p4620_p5, %p4619_p6 }
 0x76e   : > { %p4617_p4 = pneg %p4616_p3 }
 0x770   : > { %p4622_p7 = pnand %p4621_p8, %p4617_p4 }
 0x772   : > { %4625 = shalt.err (!%p4622_p7)
}
 0x773   : > { %3917 = dma.vmem_to_hbm [thread:$0]  (%p5522_p10), %s3291_s19, 128, %s3288_s16, %s3268_s23  }
 0x774   : > { %s3818_s5 = sshll.u32 %s4844_s3, 8  ;;  %s3304_s18 = sshll.u32 %s5376_s27, 4  ;;  %s3305_s18 = int_to_ptr.vmem [resolvable:$true] %s3304_s18 }
 0x775   : > { %s5523_s20 = sld [smem:[#allocation36_spill]]  ;;  %s3273_s6 = scalar_lea.sflag [#allocation13], %s4980_s25 }
 0x776   : > { %s4626_s24 = scalar_lea.vmem %s3305_s18, 256  ;;  %s4717_s21 = smov [#allocation12]  }
 0x777   : > { %p4627_p0 = scmp.ne.s32.totalorder %s3305_s18, %s4626_s24  ;;  %s4630_s2 = sshll.u32 %s4717_s21, 4  ;;  %s4631_s2 = int_to_ptr.vmem [resolvable:$false] %s4630_s2 }
 0x778   : > { %s4632_s7 = scalar_lea.vmem %s4631_s2, 512  ;;  %p4633_p9 = scmp.lt.s32.totalorder %s3305_s18, %s4631_s2 }
 0x779   : > { %p4628_p12 = pnand %p4627_p0, %p5522_p10  ;;  %p4634_p11 = scmp.lt.s32.totalorder %s4632_s7, %s4626_s24 }
 0x77b   : > { %s3302_s30 = scalar_lea.hbm %s5523_s20, %s3818_s5  ;;  %p4629_p2 = pneg %p4628_p12 }
 0x77c   : > { %p4635_p13 = por %p4634_p11, %p4633_p9 }
 0x77e   : > { %p4636_p1 = pnand %p4635_p13, %p4629_p2 }
 0x780   : > { %4639 = shalt.err (!%p4636_p1)
}
 0x781   : > { %s4640_s3 = scalar_lea.hbm %s3302_s30, 256  ;;  %s4644_s19 = scalar_lea.hbm %s5523_s20, 512 }
 0x782   : > { %p4641_p3 = scmp.ne.s32.totalorder %s3302_s30, %s4640_s3  ;;  %p4645_p5 = scmp.lt.s32.totalorder %s3302_s30, %s5523_s20 }
 0x783   : > { %p4646_p8 = scmp.lt.s32.totalorder %s4644_s19, %s4640_s3 }
 0x784   : > { %p4642_p4 = pnand %p4641_p3, %p5522_p10 }
 0x785   : > { %p4647_p7 = por %p4646_p8, %p4645_p5 }
 0x786   : > { %p4643_p6 = pneg %p4642_p4 }
 0x788   : > { %p4648_p0 = pnand %p4647_p7, %p4643_p6 }
 0x78a   : > { %4651 = shalt.err (!%p4648_p0)
}
 0x78b   : > { %3918 = dma.vmem_to_hbm [thread:$0]  (%p5522_p10), %s3305_s18, 256, %s3302_s30, %s3273_s6  }
 0x78c   : > { %s5524_s7 = sshll.u32 %s5337_s4, 3  ;;  %s5525_s0 = sld [smem:[#allocation37_spill]] }
 0x792   : > { %s741_s24 = scalar_lea.vmem %s5525_s0, %s5524_s7 }
 0x7f0   : > { %v3265_v18 = vpop.xlane.xlu0 %3264 }
 0x7f1   : > { %3266 = vst [vmem:[%s741_s24] sm:$0xff] %v3265_v18 }
 0x7f2 PF: > { %s5526_s21 = sld [smem:[#allocation23_spill]]  ;;  %s3319_s25 = sand.u32 1, %s4690_s1  }
 0x7f3   : > { %s5527_s2 = sld [smem:[#allocation20_spill]]  ;;  %s3320_s3 = scalar_lea.sflag [#allocation4], %s3319_s25 }
 0x7f8   : > { %p5528_p12 = scmp.ne.s32.totalorder %s5526_s21, 0 }
 0x7f9   : > { %p5529_p2 = scmp.ge.s32.totalorder %s5527_s2, 2 }
 0x7fb   : > { %p3939_p9 = pnand %p5529_p2, %p5528_p12 }
 0x7fd   : > { %p3940_p11 = pneg %p3939_p9 }
 0x7ff   : > { %4681 = dma.done.wait (%p3940_p11), %s3320_s3, 128  }
 0x800   : > { %4683 = vsyncadd (%p3940_p11), %s3320_s3, 4294967168  ;;  %s3329_s28 = scalar_lea.sflag [#allocation13], %s3319_s25 }
 0x801   : > { %4685 = dma.done.wait (%p3940_p11), %s3329_s28, 256  }
 0x802   : > { %4687 = vsyncadd (%p3940_p11), %s3329_s28, 4294967040  ;;  %s5530_s24 = sld [smem:[#allocation21_spill]]  ;;  %s5533_s1 = smov %s4694_s22 }
 0x803   : > { %s5531_s4 = sld [smem:[#allocation19_spill]] }
 0x804   : > { %s5532_s23 = sld [smem:[#allocation22_spill]] }
 0x808   : > { %p39_p10 = scmp.ge.s32.totalorder %s5530_s24, 4  }
 0x809   : > { %s5534_s22 = smov %s5531_s4 }
 0x80a   :  { %41 = sbr.rel (!%p39_p10) target bundleno = 24 (0x18), region = 185 }
 0x80f   :  { %3341 = vsyncpa [#allocation3], 1 }
 0x810   :  { %3343 = vsyncpa [#allocation3 + $0x1], 1 }
 0x811   :  { %3344 = vsyncpa [#allocation6], 1 }
 0x812   :  { %3345 = vsyncpa [#allocation9], 1 }
 0x813   :  { %3346 = vsyncpa [#allocation4], 1 }
 0x814   :  { %3348 = vsyncpa [#allocation4 + $0x1], 1 }
 0x815   :  { %3349 = vsyncpa [#allocation13], 1 }
 0x816   :  { %3351 = vsyncpa [#allocation13 + $0x1], 1 }

</bundles_post_ra>
